<compile_context>
chip_gen: v5e
topology: v5e:2x2
jax: 0.10.0
libtpu: 0.0.40
codegen_flags: <defaults>
</compile_context>

<pallas_src>
import functools

import jax
import jax.numpy as jnp
from jax import lax
from jax.experimental import pallas as pl
from jax.experimental.pallas import tpu as pltpu

OUT_CHANNELS = 256
BN_EPS = 1e-5
_MIB = 1024 * 1024


# ---------------------------------------------------------------------------
# Tiling / VMEM budgeting helpers
# ---------------------------------------------------------------------------
def _vmem_capacity_bytes():
    try:
        return int(pltpu.get_tpu_info().vmem_capacity_bytes)
    except Exception:
        return 64 * _MIB                       # conservative (v7x per-core VMEM)


def _fused_vmem_estimate(th, w, cin, nr, dmax):
    """Rough per-step VMEM working set of the fused kernel (bytes)."""
    cout = OUT_CHANNELS
    wpad = w + 2 * dmax
    win_h = th + 2 * dmax
    m = th * w
    lane_cin = max(cin, 128)                   # lane padding for tiny Cin
    window = 2 * win_h * wpad * lane_cin * 2   # double-buffered bf16 halo window
    weights = (cin * cout + nr * 9 * cin * cout + (nr + 1) * cout * cout) * 2 \
        + ((nr + 1) * cout + cout) * 4         # single-buffered (manual hoist)
    out_blk = 2 * m * cout * 4                 # double-buffered f32 output tile
    transients = m * (9 * lane_cin * 2 + 3 * cout * 4)   # im2col + act + acc
    return window + weights + out_blk + transients


def _pick_row_tile(h, w, cin, nr, dmax, budget, m_max=512):
    """Largest divisor of H with th*W <= m_max whose working set fits `budget`."""
    divs = [d for d in range(1, h + 1) if h % d == 0]
    ok = [d for d in divs
          if d * w <= m_max and _fused_vmem_estimate(d, w, cin, nr, dmax) <= budget]
    if ok:
        return max(ok)
    # TODO(synk): nothing fits -> needs K-(Cin)/W tiling; fall back to 1 row.
    return 1


def _pick_pool_tile(hp, wpad, cin, budget=8 * _MIB):
    divs = [d for d in range(1, hp + 1) if hp % d == 0]
    ok = [d for d in divs if 2 * d * wpad * max(cin, 128) * 2 <= budget]
    return max(ok) if ok else 1


# ---------------------------------------------------------------------------
# Kernels
# ---------------------------------------------------------------------------
def _pool_bias_kernel(xp_ref, w4_ref, b4_ref, wp4_ref, o_ref, sum_ref, *, hw_inv):
    """Global-avg-pool branch folded into a per-batch projection bias.

    Sums padded row tiles (zero padding contributes nothing), divides by the
    true H*W, then relu(mean @ W4' + b4) @ Wp_slice4.
    """
    rt = pl.program_id(1)

    @pl.when(rt == 0)
    def _():
        sum_ref[...] = jnp.zeros_like(sum_ref)

    xb = xp_ref[...].astype(jnp.float32)
    cin = xb.shape[-1]
    sum_ref[...] += jnp.sum(xb.reshape(-1, cin), axis=0, keepdims=True)

    @pl.when(rt == pl.num_programs(1) - 1)
    def _():
        mean = sum_ref[...] * hw_inv                                  # (1, Cin)
        y = jnp.maximum(
            jnp.dot(mean, w4_ref[...], preferred_element_type=jnp.float32)
            + b4_ref[...], 0.0)                                       # (1, 256)
        o_ref[...] = jnp.dot(
            y, wp4_ref[...], preferred_element_type=jnp.float32).reshape(1, 1, -1)


def _aspp_fused_kernel(xp_hbm, w0_hbm, wdil_hbm, bbr_hbm, wpm_hbm, bproj_hbm,
                       pool_ref, o_ref,
                       xwin, xsem, w0_s, wdil_s, bbr_s, wpm_s, bproj_s, wsem,
                       *, rates, dmax, th, w, cin):
    """Branches 0..3 + concat + 1x1 projection for one (batch, row-tile).

    xp_hbm : (N, Hp, Wp, Cin) bf16 padded image in HBM (windowed manually).
    Weights arrive via pl.ANY and are hoisted ONCE (per batch / per core) into
    single-buffered VMEM scratch; the halo'd row window is double-buffered.
    """
    cout = OUT_CHANNELS
    b = pl.program_id(0)
    rt = pl.program_id(1)
    nrt = pl.num_programs(1)
    win_h = th + 2 * dmax
    m = th * w

    def win_copy(row_tile, slot):
        return pltpu.make_async_copy(
            xp_hbm.at[b, pl.ds(row_tile * th, win_h), :, :],
            xwin.at[slot], xsem.at[slot])

    def weight_copies():
        return (
            pltpu.make_async_copy(w0_hbm, w0_s, wsem.at[0]),
            pltpu.make_async_copy(wdil_hbm, wdil_s, wsem.at[1]),
            pltpu.make_async_copy(bbr_hbm, bbr_s, wsem.at[2]),
            pltpu.make_async_copy(wpm_hbm, wpm_s, wsem.at[3]),
            pltpu.make_async_copy(bproj_hbm, bproj_s, wsem.at[4]),
        )

    # First row tile of this batch: prime the window pipeline and hoist weights.
    @pl.when(rt == 0)
    def _():
        win_copy(0, 0).start()
        for c in weight_copies():
            c.start()
        for c in weight_copies():
            c.wait()

    slot = rt & 1
    win_copy(rt, slot).wait()

    # Prefetch the next row window of this batch while computing the current one.
    @pl.when(rt + 1 < nrt)
    def _():
        win_copy(rt + 1, 1 - slot).start()

    def tap(ky, kx, d):
        r0 = dmax + (ky - 1) * d
        c0 = dmax + (kx - 1) * d
        rows = xwin[slot, pl.ds(r0, th), :, :]                        # (th, Wp, Cin)
        return lax.slice(rows, (0, c0, 0), (th, c0 + w, cin)).reshape(m, cin)

    # Branch 0: 1x1 conv (+ folded BN) + ReLU, projected immediately.
    y0 = jnp.maximum(
        jnp.dot(tap(1, 1, 0), w0_s[...], preferred_element_type=jnp.float32)
        + bbr_s[0:1, :], 0.0)
    acc = jnp.dot(y0.astype(jnp.bfloat16), wpm_s[0:cout, :],
                  preferred_element_type=jnp.float32)                 # (m, 256) f32

    # Branches 1..3: dilated 3x3 conv as ONE im2col matmul per rate, projected.
    for r, d in enumerate(rates):
        cols = jnp.concatenate(
            [tap(t // 3, t % 3, d) for t in range(9)], axis=-1)       # (m, 9*Cin)
        yb = jnp.maximum(
            jnp.dot(cols, wdil_s[r], preferred_element_type=jnp.float32)
            + bbr_s[r + 1:r + 2, :], 0.0)
        acc = acc + jnp.dot(yb.astype(jnp.bfloat16),
                            wpm_s[(r + 1) * cout:(r + 2) * cout, :],
                            preferred_element_type=jnp.float32)

    # Projection epilogue: + pooled-branch contribution + proj bias, ReLU.
    pre = acc + pool_ref[...].reshape(1, cout) + bproj_s[...]
    o_ref[...] = jnp.maximum(pre, 0.0).reshape(1, th, w, cout)


# ---------------------------------------------------------------------------
# pallas_call wrappers
# ---------------------------------------------------------------------------
def pool_projection_bias(xp_bf16, w4, b4, wp4, *, hw_inv, thp):
    n, hp, wpad, cin = xp_bf16.shape
    cout = OUT_CHANNELS
    kern = functools.partial(_pool_bias_kernel, hw_inv=hw_inv)
    return pl.pallas_call(
        kern,
        out_shape=jax.ShapeDtypeStruct((n, 1, cout), jnp.float32),
        grid=(n, hp // thp),
        in_specs=[
            pl.BlockSpec((1, thp, wpad, cin), lambda b, r: (b, r, 0, 0)),
            pl.BlockSpec((cin, cout), lambda b, r: (0, 0)),
            pl.BlockSpec((1, cout), lambda b, r: (0, 0)),
            pl.BlockSpec((cout, cout), lambda b, r: (0, 0)),
        ],
        out_specs=pl.BlockSpec((1, 1, cout), lambda b, r: (b, 0, 0)),
        scratch_shapes=[pltpu.VMEM((1, cin), jnp.float32)],
        compiler_params=pltpu.CompilerParams(
            dimension_semantics=("parallel", "arbitrary")),
    )(xp_bf16, w4, b4, wp4)


def aspp_fused(xp_bf16, w0, wdil, bbr, wpm, bproj, pool_bias, *, rates, dmax, th,
               vmem_limit_bytes):
    n, hp, wpad, cin = xp_bf16.shape
    h = hp - 2 * dmax
    w = wpad - 2 * dmax
    cout = OUT_CHANNELS
    nr = len(rates)
    win_h = th + 2 * dmax
    kern = functools.partial(_aspp_fused_kernel, rates=tuple(rates), dmax=dmax,
                             th=th, w=w, cin=cin)
    return pl.pallas_call(
        kern,
        out_shape=jax.ShapeDtypeStruct((n, h, w, cout), jnp.float32),
        grid=(n, h // th),
        in_specs=[
            pl.BlockSpec(memory_space=pl.ANY),                     # xp (HBM)
            pl.BlockSpec(memory_space=pl.ANY),                     # w0
            pl.BlockSpec(memory_space=pl.ANY),                     # wdil
            pl.BlockSpec(memory_space=pl.ANY),                     # bbr
            pl.BlockSpec(memory_space=pl.ANY),                     # wpm
            pl.BlockSpec(memory_space=pl.ANY),                     # bproj
            pl.BlockSpec((1, 1, cout), lambda b, r: (b, 0, 0)),    # pooled bias
        ],
        out_specs=pl.BlockSpec((1, th, w, cout), lambda b, r: (b, r, 0, 0)),
        scratch_shapes=[
            pltpu.VMEM((2, win_h, wpad, cin), jnp.bfloat16),       # halo'd windows
            pltpu.SemaphoreType.DMA((2,)),
            pltpu.VMEM((cin, cout), jnp.bfloat16),                 # w0  (1 copy)
            pltpu.VMEM((nr, 9 * cin, cout), jnp.bfloat16),         # wdil (1 copy)
            pltpu.VMEM((nr + 1, cout), jnp.float32),               # branch biases
            pltpu.VMEM(((nr + 1) * cout, cout), jnp.bfloat16),     # proj slices 0..3
            pltpu.VMEM((1, cout), jnp.float32),                    # proj bias
            pltpu.SemaphoreType.DMA((5,)),
        ],
        compiler_params=pltpu.CompilerParams(
            dimension_semantics=("parallel", "arbitrary"),
            vmem_limit_bytes=vmem_limit_bytes),
    )(xp_bf16, w0, wdil, bbr, wpm, bproj, pool_bias)


# ---------------------------------------------------------------------------
# Parameter construction (deterministic, synthetic) and BN folding
# ---------------------------------------------------------------------------
def _bn_scale_bias(key, cout):
    k1, k2, k3, k4 = jax.random.split(key, 4)
    gamma = 1.0 + 0.05 * jax.random.normal(k1, (cout,))
    beta = 0.05 * jax.random.normal(k2, (cout,))
    running_mean = 0.05 * jax.random.normal(k3, (cout,))
    running_var = 1.0 + 0.1 * jax.random.uniform(k4, (cout,))
    scale = gamma / jnp.sqrt(running_var + BN_EPS)
    bias = beta - running_mean * scale
    return (scale.reshape(1, cout).astype(jnp.float32),
            bias.reshape(1, cout).astype(jnp.float32))


def make_aspp_params(key, in_channels, atrous_rates):
    """Raw (conv weight, BN scale, BN bias) per branch, PyTorch layout semantics."""
    cout = OUT_CHANNELS
    params = {}
    keys = jax.random.split(key, 12)
    w0 = (0.05 * jax.random.normal(keys[0], (in_channels, cout))).astype(jnp.float32)
    params['b0'] = (w0, *_bn_scale_bias(keys[1], cout))
    for i, _ in enumerate(atrous_rates):
        w = (0.05 * jax.random.normal(keys[2 + 2 * i],
                                      (9, in_channels, cout))).astype(jnp.float32)
        params[f'b{i + 1}'] = (w, *_bn_scale_bias(keys[3 + 2 * i], cout))
    w4 = (0.05 * jax.random.normal(keys[8], (in_channels, cout))).astype(jnp.float32)
    params['b4'] = (w4, *_bn_scale_bias(keys[9], cout))
    wp = (0.05 * jax.random.normal(keys[10], (5 * cout, cout))).astype(jnp.float32)
    params['proj'] = (wp, *_bn_scale_bias(keys[11], cout))
    return params


def prepare_fused_params(params, atrous_rates):
    """Fold BN scales into conv weights, pack im2col weights, cast MXU ops to bf16."""
    cout = OUT_CHANNELS
    nr = len(atrous_rates)

    w0, s0, b0 = params['b0']
    cin = w0.shape[0]
    w0f = (w0 * s0).astype(jnp.bfloat16)

    wdil, bbr = [], [b0]
    for i in range(nr):
        wi, si, bi = params[f'b{i + 1}']
        wdil.append((wi * si).reshape(9 * cin, cout))        # im2col-packed
        bbr.append(bi)
    wdil = jnp.stack(wdil, axis=0).astype(jnp.bfloat16)      # (nr, 9*Cin, cout)
    bbr = jnp.concatenate(bbr, axis=0).astype(jnp.float32)   # (nr+1, cout)

    w4, s4, b4 = params['b4']
    w4f = (w4 * s4).astype(jnp.float32)                      # tiny: keep f32

    wp, sp, bp = params['proj']
    wpf = wp * sp                                            # (5*cout, cout)
    wpm = wpf[:(nr + 1) * cout].astype(jnp.bfloat16)         # slices for b0..b3
    wp4 = wpf[(nr + 1) * cout:].astype(jnp.float32)          # slice for pool branch

    return dict(w0=w0f, wdil=wdil, bbr=bbr, w4=w4f, b4=b4.astype(jnp.float32),
                wp4=wp4, wpm=wpm, bproj=bp.astype(jnp.float32))


# ---------------------------------------------------------------------------
# ASPP forward + pure-JAX reference
# ---------------------------------------------------------------------------
def aspp_forward(x_nchw, params, atrous_rates):
    fused = prepare_fused_params(params, atrous_rates)
    x = jnp.transpose(x_nchw, (0, 2, 3, 1))                          # NCHW -> NHWC
    n, h, w, cin = x.shape
    nr = len(atrous_rates)
    dmax = max(atrous_rates)

    # Single zero-pad with the maximum dilation; per-rate halos are static
    # in-kernel offsets into the halo'd row window.
    xp = jnp.pad(x.astype(jnp.bfloat16),
                 ((0, 0), (dmax, dmax), (dmax, dmax), (0, 0)))
    hp, wpad = h + 2 * dmax, w + 2 * dmax

    cap = _vmem_capacity_bytes()
    th = _pick_row_tile(h, w, cin, nr, dmax, budget=int(0.6 * cap))
    est = _fused_vmem_estimate(th, w, cin, nr, dmax)
    vmem_limit = int(min(max(1.25 * est, 32 * _MIB), 0.9 * cap))

    thp = _pick_pool_tile(hp, wpad, cin)
    pool = pool_projection_bias(xp, fused['w4'], fused['b4'], fused['wp4'],
                                hw_inv=1.0 / (h * w), thp=thp)

    y = aspp_fused(xp, fused['w0'], fused['wdil'], fused['bbr'], fused['wpm'],
                   fused['bproj'], pool, rates=atrous_rates, dmax=dmax, th=th,
                   vmem_limit_bytes=vmem_limit)
    return jnp.transpose(y, (0, 3, 1, 2))                            # NHWC -> NCHW


def aspp_reference(x_nchw, fused, atrous_rates):
    """Pure-JAX reference using the same folded weights (f32 math)."""
    cout = OUT_CHANNELS
    x = jnp.transpose(x_nchw, (0, 2, 3, 1)).astype(jnp.bfloat16).astype(jnp.float32)
    n, h, w, cin = x.shape
    res = [jnp.maximum(jnp.einsum('nhwc,co->nhwo', x,
                                  fused['w0'].astype(jnp.float32))
                       + fused['bbr'][0], 0.0)]
    wdil = fused['wdil'].astype(jnp.float32)
    for i, d in enumerate(atrous_rates):
        wk = wdil[i].reshape(3, 3, cin, cout)
        y = lax.conv_general_dilated(
            x, wk, window_strides=(1, 1), padding=((d, d), (d, d)),
            rhs_dilation=(d, d), dimension_numbers=('NHWC', 'HWIO', 'NHWC'))
        res.append(jnp.maximum(y + fused['bbr'][i + 1], 0.0))
    mean = jnp.mean(x, axis=(1, 2))
    y4 = jnp.maximum(mean @ fused['w4'] + fused['b4'], 0.0)
    res.append(jnp.broadcast_to(y4[:, None, None, :], (n, h, w, cout)))
    cat = jnp.concatenate(res, axis=-1)
    wp = jnp.concatenate([fused['wpm'].astype(jnp.float32), fused['wp4']], axis=0)
    out = jnp.maximum(jnp.einsum('nhwc,co->nhwo', cat, wp) + fused['bproj'], 0.0)
    return jnp.transpose(out, (0, 3, 1, 2))


if __name__ == "__main__":
    key = jax.random.PRNGKey(0)
    k_x, k_p, k_x2 = jax.random.split(key, 3)

    atrous_rates = (2, 4, 6)
    N, C_IN, H, W = 2, 4, 16, 16

    x = jax.random.normal(k_x, (N, C_IN, H, W), dtype=jnp.float32)   # NCHW input
    params = make_aspp_params(k_p, C_IN, atrous_rates)
    fused = prepare_fused_params(params, atrous_rates)

    out = jax.block_until_ready(aspp_forward(x, params, atrous_rates))
    assert out.shape == (N, OUT_CHANNELS, H, W), out.shape
    assert out.dtype == jnp.float32
    assert bool(jnp.all(jnp.isfinite(out)))
    ref = aspp_reference(x, fused, atrous_rates)
    err = float(jnp.max(jnp.abs(out - ref)))
    assert err < 2.5e-2, f"max abs err vs reference: {err}"

    # Taller input -> multiple row tiles per batch; exercises the double-buffered
    # halo'd-window prefetch path.
    x2 = jax.random.normal(k_x2, (1, C_IN, 64, 16), dtype=jnp.float32)
    out2 = jax.block_until_ready(aspp_forward(x2, params, atrous_rates))
    assert out2.shape == (1, OUT_CHANNELS, 64, 16)
    assert bool(jnp.all(jnp.isfinite(out2)))
    ref2 = aspp_reference(x2, fused, atrous_rates)
    err2 = float(jnp.max(jnp.abs(out2 - ref2)))
    assert err2 < 2.5e-2, f"max abs err vs reference (tall input): {err2}"

    print("KERNEL_OK")
</pallas_src>

<mosaic_0001>
module attributes {stable_mosaic.version = 11 : i64} {
  func.func @_pool_bias_kernel(%arg0: i32, %arg1: i32, %arg2: memref<1x28x28x4xbf16, #tpu.memory_space<vmem>>, %arg3: memref<4x256xf32, #tpu.memory_space<vmem>>, %arg4: memref<1x256xf32, #tpu.memory_space<vmem>>, %arg5: memref<256x256xf32, #tpu.memory_space<vmem>>, %arg6: memref<1x1x256xf32, #tpu.memory_space<vmem>>, %arg7: memref<1x4xf32, #tpu.memory_space<vmem>>) attributes {dimension_semantics = [#tpu.dimension_semantics<parallel>, #tpu.dimension_semantics<arbitrary>], iteration_bounds = array<i64: 2, 1>, scalar_prefetch = 0 : i64, scratch_operands = 1 : i64, tpu.core_type = #tpu.core_type<tc>, window_params = [{transform_indices = @transform_0, window_bounds = array<i64: 1, 28, 28, 4>}, {pipeline_mode = #tpu.pipeline_mode<synchronous>, transform_indices = @transform_1, window_bounds = array<i64: 4, 256>}, {pipeline_mode = #tpu.pipeline_mode<synchronous>, transform_indices = @transform_2, window_bounds = array<i64: 1, 256>}, {pipeline_mode = #tpu.pipeline_mode<synchronous>, transform_indices = @transform_3, window_bounds = array<i64: 256, 256>}, {transform_indices = @transform_4, window_bounds = array<i64: 1, 1, 256>}]} {
    %c0_i32 = arith.constant 0 : i32
    %0 = arith.cmpi eq, %arg1, %c0_i32 : i32
    %1 = arith.extui %0 : i1 to i32
    %c0_i32_0 = arith.constant 0 : i32
    %2 = arith.cmpi ne, %1, %c0_i32_0 : i32
    scf.if %2 {
      %cst_10 = arith.constant 0.000000e+00 : f32
      %14 = vector.broadcast %cst_10 : f32 to vector<1x4xf32>
      %c0_11 = arith.constant 0 : index
      %c0_12 = arith.constant 0 : index
      %15 = vector.load %arg7[%c0_11, %c0_12] : memref<1x4xf32, #tpu.memory_space<vmem>>, vector<1x4xf32>
      tpu.vector_store %arg7[%c0_11, %c0_12], %14 {strides = array<i32>} : memref<1x4xf32, #tpu.memory_space<vmem>>, vector<1x4xf32>,
    } else {
    }
    %c0 = arith.constant 0 : index
    %c0_1 = arith.constant 0 : index
    %c0_2 = arith.constant 0 : index
    %c0_3 = arith.constant 0 : index
    %3 = vector.load %arg2[%c0, %c0_1, %c0_2, %c0_3] : memref<1x28x28x4xbf16, #tpu.memory_space<vmem>>, vector<1x28x28x4xbf16>
    %4 = arith.extf %3 : vector<1x28x28x4xbf16> to vector<1x28x28x4xf32>
    %c0_4 = arith.constant 0 : index
    %c0_5 = arith.constant 0 : index
    %5 = vector.load %arg7[%c0_4, %c0_5] : memref<1x4xf32, #tpu.memory_space<vmem>>, vector<1x4xf32>
    %6 = vector.shape_cast %4 : vector<1x28x28x4xf32> to vector<784x4xf32>
    %cst = arith.constant dense<0.000000e+00> : vector<4xf32>
    %7 = vector.multi_reduction <add>, %6, %cst [0] : vector<784x4xf32> to vector<4xf32>
    %8 = vector.shape_cast %7 : vector<4xf32> to vector<1x4xf32>
    %9 = arith.addf %5, %8 : vector<1x4xf32>
    %c0_6 = arith.constant 0 : index
    %c0_7 = arith.constant 0 : index
    %10 = vector.load %arg7[%c0_6, %c0_7] : memref<1x4xf32, #tpu.memory_space<vmem>>, vector<1x4xf32>
    tpu.vector_store %arg7[%c0_6, %c0_7], %9 {strides = array<i32>} : memref<1x4xf32, #tpu.memory_space<vmem>>, vector<1x4xf32>,
    %c0_i32_8 = arith.constant 0 : i32
    %11 = arith.cmpi eq, %arg1, %c0_i32_8 : i32
    %12 = arith.extui %11 : i1 to i32
    %c0_i32_9 = arith.constant 0 : i32
    %13 = arith.cmpi ne, %12, %c0_i32_9 : i32
    scf.if %13 {
      %c0_10 = arith.constant 0 : index
      %c0_11 = arith.constant 0 : index
      %14 = vector.load %arg7[%c0_10, %c0_11] : memref<1x4xf32, #tpu.memory_space<vmem>>, vector<1x4xf32>
      %cst_12 = arith.constant 3.906250e-03 : f32
      %15 = vector.broadcast %cst_12 : f32 to vector<1x4xf32>
      %16 = arith.mulf %14, %15 : vector<1x4xf32>
      %c0_13 = arith.constant 0 : index
      %c0_14 = arith.constant 0 : index
      %17 = vector.load %arg3[%c0_13, %c0_14] : memref<4x256xf32, #tpu.memory_space<vmem>>, vector<4x256xf32>
      %cst_15 = arith.constant dense<0.000000e+00> : vector<1x256xf32>
      %18 = tpu.matmul %16, %17, %cst_15 {dimension_numbers = #tpu.dot_dimension_numbers<[1], [0], [0], [1], [0, 0, 1, 1], [], []>} : vector<1x4xf32>, vector<4x256xf32>, vector<1x256xf32> -> vector<1x256xf32>
      %c0_16 = arith.constant 0 : index
      %c0_17 = arith.constant 0 : index
      %19 = vector.load %arg4[%c0_16, %c0_17] : memref<1x256xf32, #tpu.memory_space<vmem>>, vector<1x256xf32>
      %20 = arith.addf %18, %19 : vector<1x256xf32>
      %cst_18 = arith.constant 0.000000e+00 : f32
      %21 = vector.broadcast %cst_18 : f32 to vector<1x256xf32>
      %22 = arith.maximumf %20, %21 : vector<1x256xf32>
      %c0_19 = arith.constant 0 : index
      %c0_20 = arith.constant 0 : index
      %23 = vector.load %arg5[%c0_19, %c0_20] : memref<256x256xf32, #tpu.memory_space<vmem>>, vector<256x256xf32>
      %cst_21 = arith.constant dense<0.000000e+00> : vector<1x256xf32>
      %24 = tpu.matmul %22, %23, %cst_21 {dimension_numbers = #tpu.dot_dimension_numbers<[1], [0], [0], [1], [0, 0, 1, 1], [], []>} : vector<1x256xf32>, vector<256x256xf32>, vector<1x256xf32> -> vector<1x256xf32>
      %25 = vector.shape_cast %24 : vector<1x256xf32> to vector<1x1x256xf32>
      %c0_22 = arith.constant 0 : index
      %c0_23 = arith.constant 0 : index
      %c0_24 = arith.constant 0 : index
      %26 = vector.load %arg6[%c0_22, %c0_23, %c0_24] : memref<1x1x256xf32, #tpu.memory_space<vmem>>, vector<1x1x256xf32>
      tpu.vector_store %arg6[%c0_22, %c0_23, %c0_24], %25 {strides = array<i32>} : memref<1x1x256xf32, #tpu.memory_space<vmem>>, vector<1x1x256xf32>,
    } else {
    }
    return
  }
  func.func @transform_0(%arg0: i32, %arg1: i32) -> (i32, i32, i32, i32) {
    %c0_i32 = arith.constant 0 : i32
    %c0_i32_0 = arith.constant 0 : i32
    %c0_i32_1 = arith.constant 0 : i32
    return %arg0, %arg1, %c0_i32, %c0_i32_0 : i32, i32, i32, i32
  }
  func.func @transform_1(%arg0: i32, %arg1: i32) -> (i32, i32) {
    %c0_i32 = arith.constant 0 : i32
    %c0_i32_0 = arith.constant 0 : i32
    %c0_i32_1 = arith.constant 0 : i32
    return %c0_i32, %c0_i32_0 : i32, i32
  }
  func.func @transform_2(%arg0: i32, %arg1: i32) -> (i32, i32) {
    %c0_i32 = arith.constant 0 : i32
    %c0_i32_0 = arith.constant 0 : i32
    %c0_i32_1 = arith.constant 0 : i32
    return %c0_i32, %c0_i32_0 : i32, i32
  }
  func.func @transform_3(%arg0: i32, %arg1: i32) -> (i32, i32) {
    %c0_i32 = arith.constant 0 : i32
    %c0_i32_0 = arith.constant 0 : i32
    %c0_i32_1 = arith.constant 0 : i32
    return %c0_i32, %c0_i32_0 : i32, i32
  }
  func.func @transform_4(%arg0: i32, %arg1: i32) -> (i32, i32, i32) {
    %c0_i32 = arith.constant 0 : i32
    %c0_i32_0 = arith.constant 0 : i32
    %c0_i32_1 = arith.constant 0 : i32
    return %arg0, %c0_i32, %c0_i32_0 : i32, i32, i32
  }
}

</mosaic_0001>

<bundles_post_ra>
// kernel: tpu_custom_call.1
= control target key start
LH: loop header
LB: loop body
LE: loop exit
PB: predicated region body
PF: predicated region fallthrough
CT: control target
= control target key end

     0   :  { %9 = vsyncpa [#allocation4], 0  ;;  %s2499_s0 = inlined_call_operand.vmem [shape: bf16[2,28,28,4], index: 0, kind: input, shape index: {}]   ;;  %s2500_s1 = inlined_call_operand.vmem [shape: f32[4,256], index: 1, kind: input, shape index: {}]   ;;  %s2501_s2 = inlined_call_operand.vmem [shape: f32[1,256], index: 2, kind: input, shape index: {}]   ;;  %s2502_s3 = inlined_call_operand.vmem [shape: f32[256,256], index: 3, kind: input, shape index: {}]   ;;  %s2503_s4 = inlined_call_operand.hbm [shape: f32[2,1,256], index: 4, kind: output, shape index: {}]  }
   0x1   :  { %11 = vsyncpa [#allocation4 + $0x1], 0  ;;  %s1888_s15 = smov 0   ;;  %s1890_s16 = smov 0  }
   0x2   :  { %s1892_s17 = smov 0   ;;  %s1894_s18 = smov 0  }
   0x3   :  { %s1896_s19 = smov 0   ;;  %s1898_s20 = smov 0  }
   0x4 LB: > { %s1571_s21 = sadd.s32 4294967295, %s1860_s20   ;;  %s1572_s22 = sadd.s32 4294967294, %s1860_s20   ;;  %s1860_s20 = sphi %s1898_s20, %s17_s20   ;;  %s1856_s19 = sphi %s1896_s19, %s2510_s19   ;;  %s1852_s18 = sphi %s1894_s18, %s2509_s18   ;;  %s1848_s17 = sphi %s1892_s17, %s2508_s17   ;;  %s1844_s16 = sphi %s1890_s16, %s2507_s16   ;;  %s1840_s15 = sphi %s1888_s15, %s2506_s15  }
   0x5   : > { %s29_s23 = sadd.s32 1, %s1856_s19  ;;  %s127_s24 = sadd.s32 1, %s1848_s17 }
   0x6   : > { %p31_p0 = scmp.ge.s32.totalorder %s29_s23, 2  ;;  %p137_p1 = scmp.ne.s32.totalorder %s1848_s17, %s1844_s16 }
   0x7   : > { %p138_p2 = scmp.eq.s32.totalorder %s1571_s21, 1  ;;  %p143_p3 = scmp.ne.s32.totalorder %s1844_s16, %s1840_s15 }
   0x8   : > { %s2512_s23 = smov (%p31_p0, %s29_s23), 0  ;;  %p144_p5 = scmp.eq.s32.totalorder %s1572_s22, 1 }
   0x9   : > { %p1928_p4 = por %p138_p2, %p137_p1  ;;  %s124_s26 = ssub.s32 %s1856_s19, %s2512_s23 }
   0xa   : > { %p1575_p6 = scmp.ge.s32.totalorder %s1860_s20, 1  ;;  %p125_p7 = scmp.eq.s32.totalorder %s124_s26, 0 }
   0xb   : > { %p1935_p8 = por %p144_p5, %p143_p3  ;;  %p185_p9 = scmp.lt.s32.totalorder %s1860_s20, 3 }
   0xc   : > { %s1941_s28 = scalar_select %p125_p7, %s1848_s17, %s127_s24  }
   0xd   : > { %p186_p10 = pnand %p1575_p6, %p185_p9 }
   0xe   : > { %p217_p11 = scmp.lt.s32.totalorder (!%p186_p10), %s1852_s18, 1  ;;  %s213_s12 = sand.u32 (!%p186_p10), 1, %s1844_s16  }
   0xf   : > { %189 = sbr.rel (%p186_p10) target bundleno = 552 (0x228), region = 36  ;;  %s1576_s13 = sshll.u32 (!%p186_p10), %s213_s12, 1 }
  0x10   : > { %s1583_s14 = sshll.u32 (!%p186_p10), %s1852_s18, 1  ;;  %s215_s26 = scalar_lea.vmem (!%p186_p10), [#allocation3], %s1576_s13 }
  0x11   : > { %s1490_s24 = scalar_lea.hbm (!%p186_p10), %s2503_s4, %s1583_s14  ;;  %s1802_s9 = scalar_lea.hbm (!%p186_p10), %s2503_s4, 4 }
  0x14   : > { %s218_s29 = scalar_select %p217_p11, %s1852_s18, 1  ;;  %vm1053_vm0 = vcmask 31744   ;;  %vm231_vm1 = vcmask 24576   ;;  %vm1277_vm2 = vcmask 1043456   ;;  %vm1471_vm3 = vcmask 1040384  }
  0x15   : > { %s1480_s18 = scalar_lea.sflag [#allocation4], %s213_s12 }
  0x16   : > { %s1725_s30 = smul.u32 448, %s218_s29  ;;  %s1492_s29 = sshll.u32 %s215_s26, 4  ;;  %s1493_s29 = int_to_ptr.vmem [resolvable:$true] %s1492_s29 }
  0x18   : > { %s1948_s7 = scalar_lea.vmem %s2499_s0, %s1725_s30  ;;  %s1494_s30 = sshll.u32 %s1490_s24, 4  ;;  %s1495_s30 = int_to_ptr.hbm [resolvable:$true] %s1494_s30 }
  0x19   : > { %v1587_v0 = vld [vmem:[%s1948_s7] sm:$0xff]   ;;  %v1698_v1 = vld [vmem:[%s1948_s7 + $0x10] sm:$0xff]   ;;  %v239_v8 = vld [vmem:[%s1948_s7 + $0x18] sm:$0xf]  ;;  %s1796_s5 = sshra.s32 %s1495_s30, 4  ;;  %s1797_s5 = int_to_ptr.hbm [resolvable:$true] %s1796_s5 }
  0x1a   : > { %v1588_v2 = vunpack.c.l.bf16 %v1587_v0  ;;  %v1589_v3 = vunpack.c.h.bf16 %v1587_v0  ;;  %v1592_v4 = vunpack.c.l.bf16 %v1698_v1  ;;  %v1593_v7 = vunpack.c.h.bf16 %v1698_v1  ;;  %v235_v10 = vld [vmem:[%s1948_s7 + $0x8] sm:$0xf]  ;;  %v236_v14 = vld [vmem:[%s1948_s7 + $0xc] sm:$0x3]  ;;  %v1699_v17 = vld [vmem:[%s1948_s7 + $0x20] sm:$0xff]   ;;  %s1798_s6 = scalar_lea.hbm %s1797_s5, 2  ;;  %p1803_p1 = scmp.lt.s32.totalorder %s1797_s5, %s2503_s4 }
  0x1b   : > { %v351_v12 = vunpack.c.l.bf16 %v239_v8  ;;  %v347_v15 = vunpack.c.l.bf16 %v235_v10  ;;  %v243_v18 = vld [vmem:[%s1948_s7 + $0x28] sm:$0xf]  ;;  %v1597_v20 = vunpack.c.h.bf16 %v1699_v17  ;;  %v348_v21 = vunpack.c.l.bf16 %v236_v14  ;;  %v240_v24 = vld [vmem:[%s1948_s7 + $0x1c] sm:$0x3]  ;;  %v1700_v28 = vld [vmem:[%s1948_s7 + $0x30] sm:$0xff]   ;;  %p1799_p12 = scmp.ne.s32.totalorder %s1797_s5, %s1798_s6  ;;  %p1804_p2 = scmp.lt.s32.totalorder %s1802_s9, %s1798_s6 }
  0x1c   : > { %654 = vst [vmem:[#allocation1] ss:$2 sm:$0xff] %v1588_v2  ;;  %v570_v5 = vrot.slane %v1588_v2, 4  ;;  %v571_v6 = vrot.slane %v1589_v3, 4  ;;  %v573_v9 = vrot.slane %v1592_v4, 4  ;;  %v574_v11 = vrot.slane %v1593_v7, 4 }
  0x1d   : > { %658 = vst [vmem:[#allocation1 + $0x10] ss:$2 sm:$0xff] %v1589_v3  ;;  %v572_v19 = vrot.slane %v347_v15, 4  ;;  %v355_v22 = vunpack.c.l.bf16 %v243_v18  ;;  %v577_v23 = vrot.slane %v1597_v20, 4  ;;  %v1596_v25 = vunpack.c.l.bf16 %v1699_v17  ;;  %v247_v29 = vld [vmem:[%s1948_s7 + $0x38] sm:$0xf]  ;;  %p1800_p13 = pnand %p1799_p12, %p1928_p4  ;;  %p1805_p3 = por %p1804_p2, %p1803_p1 }
  0x1e   : > { %668 = vst [vmem:[#allocation1 + $0x31] ss:$2 sm:$0xff] %v1592_v4  ;;  %v575_v30 = vrot.slane %v351_v12, 4  ;;  %v1601_v31 = vunpack.c.h.bf16 %v1700_v28  ;;  %v352_v33 = vunpack.c.l.bf16 %v240_v24  ;;  %v359_v34 = vunpack.c.l.bf16 %v247_v29  ;;  %v248_v38 = vld [vmem:[%s1948_s7 + $0x3c] sm:$0x3]  ;;  %v1701_v56 = vld [vmem:[%s1948_s7 + $0x40] sm:$0xff]  }
  0x1f   : > { %656 = vst [vmem:[#allocation1 + $0x1] ss:$2 sm:$0xff] %v570_v5  ;;  %v578_v26 = vrot.slane %v355_v22, 4  ;;  %v576_v35 = vrot.slane %v1596_v25, 4  ;;  %v244_v40 = vld [vmem:[%s1948_s7 + $0x2c] sm:$0x3]  ;;  %v1600_v41 = vunpack.c.l.bf16 %v1700_v28  ;;  %v360_v46 = vunpack.c.l.bf16 %v248_v38  ;;  %p1801_p0 = pneg %p1800_p13 }
  0x20   : > { %660 = vst [vmem:[#allocation1 + $0x11] ss:$2 sm:$0xff] %v571_v6  ;;  %v580_v39 = vrot.slane %v1601_v31, 4  ;;  %v581_v42 = vrot.slane %v359_v34, 4  ;;  %v251_v45 = vld [vmem:[%s1948_s7 + $0x48] sm:$0xf]  ;;  %v356_v49 = vunpack.c.l.bf16 %v244_v40  ;;  %v1604_v2 = vunpack.c.l.bf16 %v1701_v56 }
  0x21   : > { %662 = vst [vmem:[#allocation1 + $0x20] ss:$2 sm:$0xff] %v347_v15  ;;  %v363_v53 = vunpack.c.l.bf16 %v251_v45  ;;  %v579_v54 = vrot.slane %v1600_v41, 4  ;;  %v252_v59 = vld [vmem:[%s1948_s7 + $0x4c] sm:$0x3]  ;;  %v1971_v61 = vld [vmem:[%s1948_s7 + $0x50] sm:$0xff]   ;;  %v1605_v4 = vunpack.c.h.bf16 %v1701_v56  ;;  %p1806_p5 = pnand %p1805_p3, %p1801_p0 }
  0x22   : > { %664 = vst [vmem:[#allocation1 + $0x21] ss:$2 sm:$0xff] %v572_v19  ;;  %v1974_v0 = vld [vmem:[%s1948_s7 + $0x58] sm:$0xf]  ;;  %v364_v5 = vunpack.c.l.bf16 %v252_v59  ;;  %v1608_v8 = vunpack.c.l.bf16 %v1971_v61  ;;  %v256_v14 = vld [vmem:[%s1948_s7 + $0x5c] sm:$0x3] }
  0x23   : > { %666 = vst [vmem:[#allocation1 + $0x30] ss:$2 sm:$0xff] %v348_v21  ;;  %v584_v1 = vrot.slane %v363_v53, 4  ;;  %v367_v10 = vunpack.c.l.bf16 %v1974_v0  ;;  %v583_v15 = vrot.slane %v1605_v4, 4  ;;  %v368_v24 = vunpack.c.l.bf16 %v256_v14  ;;  %v263_v0 = vld [vmem:[%s1948_s7 + $0x78] sm:$0xf] }
  0x26   : > { %v669_v13 = vld.sshfl [vmem:[#allocation1] sm:$0xff pattern:$0x75316420] }
  0x27   : > { %v670_v16 = vld.sshfl [vmem:[#allocation1 + $0x10] sm:$0xff pattern:$0x75316420]  ;;  %673 = vst [vmem:[#allocation1] ss:$2 sm:$0xff] %v573_v9  ;;  %v1054_v43 = vsel %vm1053_vm0, %v669_v13, 0.0 }
  0x28   : > { %674 = vst [vmem:[#allocation1 + $0x1] ss:$2 sm:$0xff] %v1593_v7  ;;  %v1055_v44 = vsel %vm1053_vm0, %v670_v16, 0.0  ;;  %v582_v13 = vrot.slane %v1604_v2, 4 }
  0x29   : > { %675 = vst [vmem:[#allocation1 + $0x10] ss:$2 sm:$0xff] %v574_v11  ;;  %v671_v36 = vld.sshfl [vmem:[#allocation1 + $0x20] sm:$0xff pattern:$0x75316420]  ;;  %v1056_v48 = vadd.f32 %v1055_v44, %v1054_v43 }
  0x2a   : > { %676 = vst [vmem:[#allocation1 + $0x11] ss:$2 sm:$0xff] %v351_v12  ;;  %v672_v37 = vld.sshfl [vmem:[#allocation1 + $0x30] sm:$0xff pattern:$0x75316420]  ;;  %v1057_v50 = vsel %vm1053_vm0, %v671_v36, 0.0 }
  0x2b   : > { %677 = vst [vmem:[#allocation1 + $0x20] ss:$2 sm:$0xff] %v575_v30  ;;  %v1058_v52 = vadd.f32 %v1057_v50, %v1056_v48  ;;  %v1059_v55 = vsel %vm1053_vm0, %v672_v37, 0.0 }
  0x2c   : > { %678 = vst [vmem:[#allocation1 + $0x21] ss:$2 sm:$0xff] %v352_v33 }
  0x2d   : > { %679 = vst [vmem:[#allocation1 + $0x30] ss:$2 sm:$0xff] %v1596_v25  ;;  %v1060_v58 = vadd.f32 %v1059_v55, %v1058_v52  ;;  %v1703_v25 = vld [vmem:[%s1948_s7 + $0x60] sm:$0xff]  }
  0x2e   : > { %680 = vst [vmem:[#allocation1 + $0x31] ss:$2 sm:$0xff] %v576_v35  ;;  %v1612_v30 = vunpack.c.l.bf16 %v1703_v25  ;;  %v260_v35 = vld [vmem:[%s1948_s7 + $0x6c] sm:$0x3]  ;;  %v1613_v48 = vunpack.c.h.bf16 %v1703_v25 }
  0x2f   : > { %v681_v27 = vld.sshfl [vmem:[#allocation1] sm:$0xff pattern:$0x75316420]  ;;  %v372_v45 = vunpack.c.l.bf16 %v260_v35 }
  0x30   : > { %685 = vst [vmem:[#allocation1] ss:$2 sm:$0xff] %v1597_v20  ;;  %v1061_v60 = vsel %vm1053_vm0, %v681_v27, 0.0  ;;  %v587_v20 = vrot.slane %v367_v10, 4  ;;  %v589_v56 = vrot.slane %v1613_v48, 4 }
  0x31   : > { %v682_v32 = vld.sshfl [vmem:[#allocation1 + $0x10] sm:$0xff pattern:$0x75316420]  ;;  %686 = vst [vmem:[#allocation1 + $0x1] ss:$2 sm:$0xff] %v577_v23  ;;  %v1062_v63 = vadd.f32 %v1061_v60, %v1060_v58 }
  0x32   : > { %687 = vst [vmem:[#allocation1 + $0x10] ss:$2 sm:$0xff] %v355_v22  ;;  %v1063_v3 = vsel %vm1053_vm0, %v682_v32, 0.0 }
  0x33   : > { %688 = vst [vmem:[#allocation1 + $0x11] ss:$2 sm:$0xff] %v578_v26  ;;  %v683_v57 = vld.sshfl [vmem:[#allocation1 + $0x20] sm:$0xff pattern:$0x75316420]  ;;  %v1064_v6 = vadd.f32 %v1063_v3, %v1062_v63  ;;  %v1609_v26 = vunpack.c.h.bf16 %v1971_v61 }
  0x34   : > { %689 = vst [vmem:[#allocation1 + $0x20] ss:$2 sm:$0xff] %v356_v49  ;;  %v1065_v9 = vsel %vm1053_vm0, %v683_v57, 0.0 }
  0x35   : > { %v684_v62 = vld.sshfl [vmem:[#allocation1 + $0x30] sm:$0xff pattern:$0x75316420]  ;;  %690 = vst [vmem:[#allocation1 + $0x21] ss:$2 sm:$0xff] %v1600_v41  ;;  %v1066_v11 = vadd.f32 %v1065_v9, %v1064_v6  ;;  %v586_v36 = vrot.slane %v1609_v26, 4 }
  0x36   : > { %691 = vst [vmem:[#allocation1 + $0x30] ss:$2 sm:$0xff] %v579_v54  ;;  %v1067_v16 = vsel %vm1053_vm0, %v684_v62, 0.0  ;;  %v259_v41 = vld [vmem:[%s1948_s7 + $0x68] sm:$0xf]  ;;  %v2008_v6 = vld [vmem:[%s1948_s7 + $0x90] sm:$0xff]  }
  0x37   : > { %692 = vst [vmem:[#allocation1 + $0x31] ss:$2 sm:$0xff] %v1601_v31  ;;  %v1068_v18 = vadd.f32 %v1067_v16, %v1066_v11  ;;  %v585_v31 = vrot.slane %v1608_v8, 4  ;;  %v375_v11 = vunpack.c.l.bf16 %v263_v0 }
  0x38   : > { %v693_v47 = vld.sshfl [vmem:[#allocation1] sm:$0xff pattern:$0x75316420] }
  0x39   : > { %697 = vst [vmem:[#allocation1] ss:$2 sm:$0xff] %v580_v39  ;;  %v1069_v19 = vsel %vm1053_vm0, %v693_v47, 0.0  ;;  %v1991_v39 = vld [vmem:[%s1948_s7 + $0x70] sm:$0xff]  }
  0x3a   : > { %v694_v51 = vld.sshfl [vmem:[#allocation1 + $0x10] sm:$0xff pattern:$0x75316420]  ;;  %698 = vst [vmem:[#allocation1 + $0x1] ss:$2 sm:$0xff] %v359_v34  ;;  %v1070_v22 = vadd.f32 %v1069_v19, %v1068_v18  ;;  %v1616_v47 = vunpack.c.l.bf16 %v1991_v39  ;;  %v1617_v3 = vunpack.c.h.bf16 %v1991_v39 }
  0x3b   : > { %699 = vst [vmem:[#allocation1 + $0x10] ss:$2 sm:$0xff] %v581_v42  ;;  %v1071_v23 = vsel %vm1053_vm0, %v694_v51, 0.0  ;;  %v588_v42 = vrot.slane %v1612_v30, 4  ;;  %v1998_v51 = vld [vmem:[%s1948_s7 + $0x80] sm:$0xff]  }
  0x3c   : > { %700 = vst [vmem:[#allocation1 + $0x11] ss:$2 sm:$0xff] %v360_v46  ;;  %v695_v17 = vld.sshfl [vmem:[#allocation1 + $0x20] sm:$0xff pattern:$0x75316420]  ;;  %v1072_v27 = vadd.f32 %v1071_v23, %v1070_v22  ;;  %v1620_v59 = vunpack.c.l.bf16 %v1998_v51  ;;  %v592_v16 = vrot.slane %v1617_v3, 4 }
  0x3d   : > { %701 = vst [vmem:[#allocation1 + $0x20] ss:$2 sm:$0xff] %v1604_v2  ;;  %v1073_v28 = vsel %vm1053_vm0, %v695_v17, 0.0  ;;  %v264_v17 = vld [vmem:[%s1948_s7 + $0x7c] sm:$0x3] }
  0x3e   : > { %v696_v21 = vld.sshfl [vmem:[#allocation1 + $0x30] sm:$0xff pattern:$0x75316420]  ;;  %702 = vst [vmem:[#allocation1 + $0x21] ss:$2 sm:$0xff] %v582_v13  ;;  %v1074_v32 = vadd.f32 %v1073_v28, %v1072_v27  ;;  %v376_v23 = vunpack.c.l.bf16 %v264_v17 }
  0x3f   : > { %703 = vst [vmem:[#allocation1 + $0x30] ss:$2 sm:$0xff] %v1605_v4  ;;  %v1075_v33 = vsel %vm1053_vm0, %v696_v21, 0.0  ;;  %v594_v4 = vrot.slane %v1620_v59, 4  ;;  %v267_v22 = vld [vmem:[%s1948_s7 + $0x88] sm:$0xf] }
  0x40   : > { %704 = vst [vmem:[#allocation1 + $0x31] ss:$2 sm:$0xff] %v583_v15  ;;  %v1076_v37 = vadd.f32 %v1075_v33, %v1074_v32  ;;  %v1624_v15 = vunpack.c.l.bf16 %v2008_v6  ;;  %v379_v32 = vunpack.c.l.bf16 %v267_v22 }
  0x41   : > { %v705_v7 = vld.sshfl [vmem:[#allocation1] sm:$0xff pattern:$0x75316420] }
  0x42   : > { %709 = vst [vmem:[#allocation1] ss:$2 sm:$0xff] %v363_v53  ;;  %v1077_v38 = vsel %vm1053_vm0, %v705_v7, 0.0  ;;  %v371_v53 = vunpack.c.l.bf16 %v259_v41  ;;  %v591_v7 = vrot.slane %v1616_v47, 4  ;;  %v597_v27 = vrot.slane %v1624_v15, 4 }
  0x43   : > { %v706_v12 = vld.sshfl [vmem:[#allocation1 + $0x10] sm:$0xff pattern:$0x75316420]  ;;  %710 = vst [vmem:[#allocation1 + $0x1] ss:$2 sm:$0xff] %v584_v1  ;;  %v1078_v43 = vadd.f32 %v1077_v38, %v1076_v37  ;;  %v1707_v38 = vld [vmem:[%s1948_s7 + $0xa0] sm:$0xff]  }
  0x44   : > { %711 = vst [vmem:[#allocation1 + $0x10] ss:$2 sm:$0xff] %v364_v5  ;;  %v1079_v44 = vsel %vm1053_vm0, %v706_v12, 0.0  ;;  %v590_v60 = vrot.slane %v371_v53, 4  ;;  %v268_v37 = vld [vmem:[%s1948_s7 + $0x8c] sm:$0x3] }
  0x45   : > { %712 = vst [vmem:[#allocation1 + $0x11] ss:$2 sm:$0xff] %v1608_v8  ;;  %v707_v40 = vld.sshfl [vmem:[#allocation1 + $0x20] sm:$0xff pattern:$0x75316420]  ;;  %v1080_v49 = vadd.f32 %v1079_v44, %v1078_v43  ;;  %v596_v41 = vrot.slane %v379_v32, 4  ;;  %v380_v44 = vunpack.c.l.bf16 %v268_v37 }
  0x46   : > { %713 = vst [vmem:[#allocation1 + $0x20] ss:$2 sm:$0xff] %v585_v31  ;;  %v1081_v50 = vsel %vm1053_vm0, %v707_v40, 0.0  ;;  %v1629_v40 = vunpack.c.h.bf16 %v1707_v38  ;;  %v271_v43 = vld [vmem:[%s1948_s7 + $0x98] sm:$0xf] }
  0x47   : > { %v708_v46 = vld.sshfl [vmem:[#allocation1 + $0x30] sm:$0xff pattern:$0x75316420]  ;;  %714 = vst [vmem:[#allocation1 + $0x21] ss:$2 sm:$0xff] %v1609_v26  ;;  %v1082_v54 = vadd.f32 %v1081_v50, %v1080_v49  ;;  %v1621_v26 = vunpack.c.h.bf16 %v1998_v51  ;;  %v383_v50 = vunpack.c.l.bf16 %v271_v43 }
  0x48   : > { %715 = vst [vmem:[#allocation1 + $0x30] ss:$2 sm:$0xff] %v586_v36  ;;  %v1083_v55 = vsel %vm1053_vm0, %v708_v46, 0.0  ;;  %v601_v49 = vrot.slane %v1629_v40, 4  ;;  %v288_v37 = vld [vmem:[%s1948_s7 + $0xdc] sm:$0x3] }
  0x49   : > { %716 = vst [vmem:[#allocation1 + $0x31] ss:$2 sm:$0xff] %v367_v10  ;;  %v1084_v57 = vadd.f32 %v1083_v55, %v1082_v54  ;;  %v595_v36 = vrot.slane %v1621_v26, 4 }
  0x4a   : > { %v717_v29 = vld.sshfl [vmem:[#allocation1] sm:$0xff pattern:$0x75316420] }
  0x4b   : > { %721 = vst [vmem:[#allocation1] ss:$2 sm:$0xff] %v587_v20  ;;  %v1085_v58 = vsel %vm1053_vm0, %v717_v29, 0.0  ;;  %v593_v20 = vrot.slane %v375_v11, 4  ;;  %v1625_v29 = vunpack.c.h.bf16 %v2008_v6 }
  0x4c   : > { %722 = vst [vmem:[#allocation1 + $0x1] ss:$2 sm:$0xff] %v368_v24  ;;  %v718_v34 = vld.sshfl [vmem:[#allocation1 + $0x10] sm:$0xff pattern:$0x75316420]  ;;  %v1086_v62 = vadd.f32 %v1085_v58, %v1084_v57 }
  0x4d   : > { %723 = vst [vmem:[#allocation1 + $0x10] ss:$2 sm:$0xff] %v1612_v30  ;;  %v1087_v63 = vsel %vm1053_vm0, %v718_v34, 0.0  ;;  %v598_v55 = vrot.slane %v1625_v29, 4  ;;  %v272_v57 = vld [vmem:[%s1948_s7 + $0x9c] sm:$0x3] }
  0x4e   : > { %724 = vst [vmem:[#allocation1 + $0x11] ss:$2 sm:$0xff] %v588_v42  ;;  %v719_v61 = vld.sshfl [vmem:[#allocation1 + $0x20] sm:$0xff pattern:$0x75316420]  ;;  %v1088_v2 = vadd.f32 %v1087_v63, %v1086_v62  ;;  %v599_v62 = vrot.slane %v383_v50, 4  ;;  %v384_v0 = vunpack.c.l.bf16 %v272_v57 }
  0x4f   : > { %725 = vst [vmem:[#allocation1 + $0x20] ss:$2 sm:$0xff] %v1613_v48  ;;  %v1089_v5 = vsel %vm1053_vm0, %v719_v61, 0.0  ;;  %v275_v61 = vld [vmem:[%s1948_s7 + $0xa8] sm:$0xf] }
  0x50   : > { %v720_v1 = vld.sshfl [vmem:[#allocation1 + $0x30] sm:$0xff pattern:$0x75316420]  ;;  %726 = vst [vmem:[#allocation1 + $0x21] ss:$2 sm:$0xff] %v589_v56  ;;  %v1090_v8 = vadd.f32 %v1089_v5, %v1088_v2 }
  0x51   : > { %727 = vst [vmem:[#allocation1 + $0x30] ss:$2 sm:$0xff] %v371_v53  ;;  %v1091_v9 = vsel %vm1053_vm0, %v720_v1, 0.0  ;;  %v279_v2 = vld [vmem:[%s1948_s7 + $0xb8] sm:$0xf] }
  0x52   : > { %728 = vst [vmem:[#allocation1 + $0x31] ss:$2 sm:$0xff] %v590_v60  ;;  %v1092_v13 = vadd.f32 %v1091_v9, %v1090_v8  ;;  %v387_v9 = vunpack.c.l.bf16 %v275_v61  ;;  %v391_v6 = vunpack.c.l.bf16 %v279_v2 }
  0x53   : > { %v729_v52 = vld.sshfl [vmem:[#allocation1] sm:$0xff pattern:$0x75316420] }
  0x54   : > { %733 = vst [vmem:[#allocation1] ss:$2 sm:$0xff] %v372_v45  ;;  %v1093_v14 = vsel %vm1053_vm0, %v729_v52, 0.0 }
  0x55   : > { %734 = vst [vmem:[#allocation1 + $0x1] ss:$2 sm:$0xff] %v1616_v47  ;;  %v730_v12 = vld.sshfl [vmem:[#allocation1 + $0x10] sm:$0xff pattern:$0x75316420]  ;;  %v1094_v18 = vadd.f32 %v1093_v14, %v1092_v13 }
  0x56   : > { %735 = vst [vmem:[#allocation1 + $0x10] ss:$2 sm:$0xff] %v591_v7  ;;  %v1095_v19 = vsel %vm1053_vm0, %v730_v12, 0.0  ;;  %v276_v14 = vld [vmem:[%s1948_s7 + $0xac] sm:$0x3] }
  0x57   : > { %v731_v21 = vld.sshfl [vmem:[#allocation1 + $0x20] sm:$0xff pattern:$0x75316420]  ;;  %736 = vst [vmem:[#allocation1 + $0x11] ss:$2 sm:$0xff] %v1617_v3  ;;  %v1096_v24 = vadd.f32 %v1095_v19, %v1094_v18 }
  0x58   : > { %v1097_v25 = vsel %vm1053_vm0, %v731_v21, 0.0  ;;  %737 = vst [vmem:[#allocation1 + $0x20] ss:$2 sm:$0xff] %v592_v16  ;;  %v602_v16 = vrot.slane %v387_v9, 4 }
  0x59   : > { %v732_v28 = vld.sshfl [vmem:[#allocation1 + $0x30] sm:$0xff pattern:$0x75316420]  ;;  %738 = vst [vmem:[#allocation1 + $0x21] ss:$2 sm:$0xff] %v375_v11  ;;  %v1098_v30 = vadd.f32 %v1097_v25, %v1096_v24 }
  0x5a   : > { %v1099_v31 = vsel %vm1053_vm0, %v732_v28, 0.0  ;;  %739 = vst [vmem:[#allocation1 + $0x30] ss:$2 sm:$0xff] %v593_v20  ;;  %v283_v11 = vld [vmem:[%s1948_s7 + $0xc8] sm:$0xf]  ;;  %v388_v20 = vunpack.c.l.bf16 %v276_v14 }
  0x5b   : > { %740 = vst [vmem:[#allocation1 + $0x31] ss:$2 sm:$0xff] %v376_v23  ;;  %v1100_v34 = vadd.f32 %v1099_v31, %v1098_v30  ;;  %v395_v19 = vunpack.c.l.bf16 %v283_v11  ;;  %v2051_v30 = vld [vmem:[%s1948_s7 + $0xd8] sm:$0xf] }
  0x5c   : > { %v741_v10 = vld.sshfl [vmem:[#allocation1] sm:$0xff pattern:$0x75316420] }
  0x5d   : > { %745 = vst [vmem:[#allocation1] ss:$2 sm:$0xff] %v1620_v59  ;;  %v1101_v35 = vsel %vm1053_vm0, %v741_v10, 0.0  ;;  %v2032_v59 = vld [vmem:[%s1948_s7 + $0xb0] sm:$0xff]   ;;  %v608_v28 = vrot.slane %v395_v19, 4 }
  0x5e   : > { %746 = vst [vmem:[#allocation1 + $0x1] ss:$2 sm:$0xff] %v594_v4  ;;  %v1102_v39 = vadd.f32 %v1101_v35, %v1100_v34  ;;  %v742_v42 = vld.sshfl [vmem:[#allocation1 + $0x10] sm:$0xff pattern:$0x75316420]  ;;  %v1633_v60 = vunpack.c.h.bf16 %v2032_v59  ;;  %v1628_v4 = vunpack.c.l.bf16 %v1707_v38  ;;  %v1632_v23 = vunpack.c.l.bf16 %v2032_v59  ;;  %v1709_v35 = vld [vmem:[%s1948_s7 + $0xc0] sm:$0xff]  }
  0x5f   : > { %747 = vst [vmem:[#allocation1 + $0x10] ss:$2 sm:$0xff] %v1621_v26  ;;  %v1103_v45 = vsel %vm1053_vm0, %v742_v42, 0.0  ;;  %v280_v34 = vld [vmem:[%s1948_s7 + $0xbc] sm:$0x3]  ;;  %v399_v38 = vunpack.c.l.bf16 %v2051_v30  ;;  %v1636_v42 = vunpack.c.l.bf16 %v1709_v35 }
  0x60   : > { %v743_v46 = vld.sshfl [vmem:[#allocation1 + $0x20] sm:$0xff pattern:$0x75316420]  ;;  %748 = vst [vmem:[#allocation1 + $0x11] ss:$2 sm:$0xff] %v595_v36  ;;  %v1104_v47 = vadd.f32 %v1103_v45, %v1102_v39  ;;  %v604_v8 = vrot.slane %v1633_v60, 4  ;;  %v392_v43 = vunpack.c.l.bf16 %v280_v34 }
  0x61   : > { %749 = vst [vmem:[#allocation1 + $0x20] ss:$2 sm:$0xff] %v379_v32  ;;  %v1105_v48 = vsel %vm1053_vm0, %v743_v46, 0.0  ;;  %v600_v12 = vrot.slane %v1628_v4, 4  ;;  %v603_v32 = vrot.slane %v1632_v23, 4  ;;  %v605_v39 = vrot.slane %v391_v6, 4 }
  0x62   : > { %v744_v51 = vld.sshfl [vmem:[#allocation1 + $0x30] sm:$0xff pattern:$0x75316420]  ;;  %750 = vst [vmem:[#allocation1 + $0x21] ss:$2 sm:$0xff] %v596_v41  ;;  %v1106_v52 = vadd.f32 %v1105_v48, %v1104_v47  ;;  %v611_v47 = vrot.slane %v399_v38, 4  ;;  %v1637_v48 = vunpack.c.h.bf16 %v1709_v35 }
  0x63   : > { %751 = vst [vmem:[#allocation1 + $0x30] ss:$2 sm:$0xff] %v380_v44  ;;  %v1107_v53 = vsel %vm1053_vm0, %v744_v51, 0.0  ;;  %v400_v51 = vunpack.c.l.bf16 %v288_v37  ;;  %v2087_v34 = vld [vmem:[%s1948_s7 + $0x110] sm:$0xff]  }
  0x64   : > { %v1108_v58 = vadd.f32 %v1107_v53, %v1106_v52  ;;  %752 = vst [vmem:[#allocation1 + $0x31] ss:$2 sm:$0xff] %v1624_v15  ;;  %v284_v53 = vld [vmem:[%s1948_s7 + $0xcc] sm:$0x3]  ;;  %v607_v59 = vrot.slane %v1637_v48, 4 }
  0x65   : > { %v753_v33 = vld.sshfl [vmem:[#allocation1] sm:$0xff pattern:$0x75316420] }
  0x66   : > { %757 = vst [vmem:[#allocation1] ss:$2 sm:$0xff] %v597_v27  ;;  %v1109_v54 = vsel %vm1053_vm0, %v753_v33, 0.0 }
  0x67   : > { %758 = vst [vmem:[#allocation1 + $0x1] ss:$2 sm:$0xff] %v1625_v29  ;;  %v1110_v63 = vadd.f32 %v1109_v54, %v1108_v58  ;;  %v754_v1 = vld.sshfl [vmem:[#allocation1 + $0x10] sm:$0xff pattern:$0x75316420]  ;;  %v606_v54 = vrot.slane %v1636_v42, 4 }
  0x68   : > { %759 = vst [vmem:[#allocation1 + $0x10] ss:$2 sm:$0xff] %v598_v55  ;;  %v1111_v3 = vsel %vm1053_vm0, %v754_v1, 0.0  ;;  %v1710_v58 = vld [vmem:[%s1948_s7 + $0xd0] sm:$0xff]  }
  0x69   : > { %v755_v5 = vld.sshfl [vmem:[#allocation1 + $0x20] sm:$0xff pattern:$0x75316420]  ;;  %760 = vst [vmem:[#allocation1 + $0x11] ss:$2 sm:$0xff] %v383_v50  ;;  %v1112_v7 = vadd.f32 %v1111_v3, %v1110_v63  ;;  %v1640_v1 = vunpack.c.l.bf16 %v1710_v58 }
  0x6a   : > { %761 = vst [vmem:[#allocation1 + $0x20] ss:$2 sm:$0xff] %v599_v62  ;;  %v1113_v10 = vsel %vm1053_vm0, %v755_v5, 0.0  ;;  %v396_v62 = vunpack.c.l.bf16 %v284_v53 }
  0x6b   : > { %762 = vst [vmem:[#allocation1 + $0x21] ss:$2 sm:$0xff] %v384_v0  ;;  %v1114_v15 = vadd.f32 %v1113_v10, %v1112_v7  ;;  %v756_v17 = vld.sshfl [vmem:[#allocation1 + $0x30] sm:$0xff pattern:$0x75316420]  ;;  %v1641_v7 = vunpack.c.h.bf16 %v1710_v58  ;;  %v1711_v10 = vld [vmem:[%s1948_s7 + $0xe0] sm:$0xff]  }
  0x6c   : > { %763 = vst [vmem:[#allocation1 + $0x30] ss:$2 sm:$0xff] %v1628_v4  ;;  %v1115_v22 = vsel %vm1053_vm0, %v756_v17, 0.0  ;;  %v2069_v0 = vld [vmem:[%s1948_s7 + $0xf0] sm:$0xff]  }
  0x6d   : > { %764 = vst [vmem:[#allocation1 + $0x31] ss:$2 sm:$0xff] %v600_v12  ;;  %v1116_v24 = vadd.f32 %v1115_v22, %v1114_v15  ;;  %v609_v12 = vrot.slane %v1640_v1, 4  ;;  %v610_v17 = vrot.slane %v1641_v7, 4 }
  0x6e   : > { %v765_v56 = vld.sshfl [vmem:[#allocation1] sm:$0xff pattern:$0x75316420] }
  0x6f   : > { %769 = vst [vmem:[#allocation1] ss:$2 sm:$0xff] %v1629_v40  ;;  %v1117_v18 = vsel %vm1053_vm0, %v765_v56, 0.0 }
  0x70   : > { %770 = vst [vmem:[#allocation1 + $0x1] ss:$2 sm:$0xff] %v601_v49  ;;  %v766_v21 = vld.sshfl [vmem:[#allocation1 + $0x10] sm:$0xff pattern:$0x75316420]  ;;  %v1118_v27 = vadd.f32 %v1117_v18, %v1116_v24 }
  0x71   : > { %771 = vst [vmem:[#allocation1 + $0x10] ss:$2 sm:$0xff] %v387_v9  ;;  %v1119_v26 = vsel %vm1053_vm0, %v766_v21, 0.0  ;;  %v1648_v9 = vunpack.c.l.bf16 %v2069_v0 }
  0x72   : > { %v767_v25 = vld.sshfl [vmem:[#allocation1 + $0x20] sm:$0xff pattern:$0x75316420]  ;;  %772 = vst [vmem:[#allocation1 + $0x11] ss:$2 sm:$0xff] %v602_v16  ;;  %v1120_v31 = vadd.f32 %v1119_v26, %v1118_v27  ;;  %v1644_v16 = vunpack.c.l.bf16 %v1711_v10  ;;  %v1645_v26 = vunpack.c.h.bf16 %v1711_v10 }
  0x73   : > { %773 = vst [vmem:[#allocation1 + $0x20] ss:$2 sm:$0xff] %v388_v20  ;;  %v1121_v29 = vsel %vm1053_vm0, %v767_v25, 0.0 }
  0x74   : > { %774 = vst [vmem:[#allocation1 + $0x21] ss:$2 sm:$0xff] %v1632_v23  ;;  %v1122_v36 = vadd.f32 %v1121_v29, %v1120_v31  ;;  %v768_v40 = vld.sshfl [vmem:[#allocation1 + $0x30] sm:$0xff pattern:$0x75316420]  ;;  %v612_v27 = vrot.slane %v1644_v16, 4 }
  0x75   : > { %775 = vst [vmem:[#allocation1 + $0x30] ss:$2 sm:$0xff] %v603_v32  ;;  %v1123_v45 = vsel %vm1053_vm0, %v768_v40, 0.0  ;;  %v291_v23 = vld [vmem:[%s1948_s7 + $0xe8] sm:$0xf]  ;;  %v613_v37 = vrot.slane %v1645_v26, 4  ;;  %v1656_v40 = vunpack.c.l.bf16 %v2087_v34 }
  0x76   : > { %776 = vst [vmem:[#allocation1 + $0x31] ss:$2 sm:$0xff] %v1633_v60  ;;  %v1124_v46 = vadd.f32 %v1123_v45, %v1122_v36  ;;  %v292_v60 = vld [vmem:[%s1948_s7 + $0xec] sm:$0x3]  ;;  %v403_v31 = vunpack.c.l.bf16 %v291_v23 }
  0x77   : > { %v777_v13 = vld.sshfl [vmem:[#allocation1] sm:$0xff pattern:$0x75316420]  ;;  %v404_v5 = vunpack.c.l.bf16 %v292_v60 }
  0x78   : > { %781 = vst [vmem:[#allocation1] ss:$2 sm:$0xff] %v604_v8  ;;  %v1125_v41 = vsel %vm1053_vm0, %v777_v13, 0.0  ;;  %v2077_v13 = vld [vmem:[%s1948_s7 + $0x100] sm:$0xff]   ;;  %v614_v30 = vrot.slane %v403_v31, 4 }
  0x79   : > { %782 = vst [vmem:[#allocation1 + $0x1] ss:$2 sm:$0xff] %v391_v6  ;;  %v778_v44 = vld.sshfl [vmem:[#allocation1 + $0x10] sm:$0xff pattern:$0x75316420]  ;;  %v1126_v52 = vadd.f32 %v1125_v41, %v1124_v46  ;;  %v1652_v20 = vunpack.c.l.bf16 %v2077_v13  ;;  %v1649_v46 = vunpack.c.h.bf16 %v2069_v0 }
  0x7a   : > { %v1127_v50 = vsel %vm1053_vm0, %v778_v44, 0.0  ;;  %783 = vst [vmem:[#allocation1 + $0x10] ss:$2 sm:$0xff] %v605_v39  ;;  %v295_v41 = vld [vmem:[%s1948_s7 + $0xf8] sm:$0xf] }
  0x7b   : > { %v779_v49 = vld.sshfl [vmem:[#allocation1 + $0x20] sm:$0xff pattern:$0x75316420]  ;;  %784 = vst [vmem:[#allocation1 + $0x11] ss:$2 sm:$0xff] %v392_v43  ;;  %v1128_v57 = vadd.f32 %v1127_v50, %v1126_v52  ;;  %v618_v29 = vrot.slane %v1652_v20, 4  ;;  %v407_v52 = vunpack.c.l.bf16 %v295_v41 }
  0x7c   : > { %v1129_v55 = vsel %vm1053_vm0, %v779_v49, 0.0  ;;  %785 = vst [vmem:[#allocation1 + $0x20] ss:$2 sm:$0xff] %v1636_v42  ;;  %v615_v43 = vrot.slane %v1648_v9, 4  ;;  %v621_v49 = vrot.slane %v1656_v40, 4 }
  0x7d   : > { %v1130_v61 = vadd.f32 %v1129_v55, %v1128_v57  ;;  %v780_v63 = vld.sshfl [vmem:[#allocation1 + $0x30] sm:$0xff pattern:$0x75316420]  ;;  %786 = vst [vmem:[#allocation1 + $0x21] ss:$2 sm:$0xff] %v606_v54  ;;  %v616_v57 = vrot.slane %v1649_v46, 4 }
  0x7e   : > { %787 = vst [vmem:[#allocation1 + $0x30] ss:$2 sm:$0xff] %v1637_v48  ;;  %v1131_v2 = vsel %vm1053_vm0, %v780_v63, 0.0  ;;  %v296_v54 = vld [vmem:[%s1948_s7 + $0xfc] sm:$0x3] }
  0x7f   : > { %788 = vst [vmem:[#allocation1 + $0x31] ss:$2 sm:$0xff] %v607_v59  ;;  %v1132_v4 = vadd.f32 %v1131_v2, %v1130_v61  ;;  %v1653_v59 = vunpack.c.h.bf16 %v2077_v13  ;;  %v2103_v61 = vld [vmem:[%s1948_s7 + $0x120] sm:$0xff]   ;;  %v299_v0 = vld [vmem:[%s1948_s7 + $0x108] sm:$0xf] }
  0x80   : > { %v789_v33 = vld.sshfl [vmem:[#allocation1] sm:$0xff pattern:$0x75316420]  ;;  %v1661_v63 = vunpack.c.h.bf16 %v2103_v61  ;;  %v300_v13 = vld [vmem:[%s1948_s7 + $0x10c] sm:$0x3]  ;;  %v1660_v41 = vunpack.c.l.bf16 %v2103_v61 }
  0x81   : > { %793 = vst [vmem:[#allocation1] ss:$2 sm:$0xff] %v395_v19  ;;  %v1133_v3 = vsel %vm1053_vm0, %v789_v33, 0.0 }
  0x82   : > { %794 = vst [vmem:[#allocation1 + $0x1] ss:$2 sm:$0xff] %v608_v28  ;;  %v790_v8 = vld.sshfl [vmem:[#allocation1 + $0x10] sm:$0xff pattern:$0x75316420]  ;;  %v1134_v6 = vadd.f32 %v1133_v3, %v1132_v4 }
  0x83   : > { %795 = vst [vmem:[#allocation1 + $0x10] ss:$2 sm:$0xff] %v396_v62  ;;  %v1135_v11 = vsel %vm1053_vm0, %v790_v8, 0.0  ;;  %v617_v62 = vrot.slane %v407_v52, 4 }
  0x84   : > { %796 = vst [vmem:[#allocation1 + $0x11] ss:$2 sm:$0xff] %v1640_v1  ;;  %v1136_v15 = vadd.f32 %v1135_v11, %v1134_v6  ;;  %v791_v18 = vld.sshfl [vmem:[#allocation1 + $0x20] sm:$0xff pattern:$0x75316420]  ;;  %v408_v1 = vunpack.c.l.bf16 %v296_v54  ;;  %v625_v6 = vrot.slane %v1661_v63, 4 }
  0x85   : > { %v1137_v19 = vsel %vm1053_vm0, %v791_v18, 0.0  ;;  %797 = vst [vmem:[#allocation1 + $0x20] ss:$2 sm:$0xff] %v609_v12 }
  0x86   : > { %v792_v21 = vld.sshfl [vmem:[#allocation1 + $0x30] sm:$0xff pattern:$0x75316420]  ;;  %v1138_v22 = vadd.f32 %v1137_v19, %v1136_v15  ;;  %798 = vst [vmem:[#allocation1 + $0x21] ss:$2 sm:$0xff] %v1641_v7 }
  0x87   : > { %v1139_v24 = vsel %vm1053_vm0, %v792_v21, 0.0  ;;  %799 = vst [vmem:[#allocation1 + $0x30] ss:$2 sm:$0xff] %v610_v17  ;;  %v2113_v15 = vld [vmem:[%s1948_s7 + $0x130] sm:$0xff]   ;;  %v412_v21 = vunpack.c.l.bf16 %v300_v13 }
  0x88   : > { %v1140_v28 = vadd.f32 %v1139_v24, %v1138_v22  ;;  %800 = vst [vmem:[#allocation1 + $0x31] ss:$2 sm:$0xff] %v399_v38  ;;  %v1665_v18 = vunpack.c.h.bf16 %v2113_v15  ;;  %v2118_v24 = vld [vmem:[%s1948_s7 + $0x138] sm:$0xf] }
  0x89   : > { %v801_v56 = vld.sshfl [vmem:[#allocation1] sm:$0xff pattern:$0x75316420] }
  0x8a   : > { %805 = vst [vmem:[#allocation1] ss:$2 sm:$0xff] %v611_v47  ;;  %v1141_v25 = vsel %vm1053_vm0, %v801_v56, 0.0 }
  0x8b   : > { %806 = vst [vmem:[#allocation1 + $0x1] ss:$2 sm:$0xff] %v400_v51  ;;  %v802_v32 = vld.sshfl [vmem:[#allocation1 + $0x10] sm:$0xff pattern:$0x75316420]  ;;  %v1142_v33 = vadd.f32 %v1141_v25, %v1140_v28  ;;  %v1657_v51 = vunpack.c.h.bf16 %v2087_v34 }
  0x8c   : > { %807 = vst [vmem:[#allocation1 + $0x10] ss:$2 sm:$0xff] %v1644_v16  ;;  %v1143_v35 = vsel %vm1053_vm0, %v802_v32, 0.0  ;;  %v304_v28 = vld [vmem:[%s1948_s7 + $0x11c] sm:$0x3] }
  0x8d   : > { %808 = vst [vmem:[#allocation1 + $0x11] ss:$2 sm:$0xff] %v612_v27  ;;  %v1144_v39 = vadd.f32 %v1143_v35, %v1142_v33  ;;  %v803_v38 = vld.sshfl [vmem:[#allocation1 + $0x20] sm:$0xff pattern:$0x75316420]  ;;  %v622_v25 = vrot.slane %v1657_v51, 4 }
  0x8e   : > { %809 = vst [vmem:[#allocation1 + $0x20] ss:$2 sm:$0xff] %v1645_v26  ;;  %v1145_v42 = vsel %vm1053_vm0, %v803_v38, 0.0  ;;  %v628_v27 = vrot.slane %v1665_v18, 4  ;;  %v307_v33 = vld [vmem:[%s1948_s7 + $0x128] sm:$0xf] }
  0x8f   : > { %v804_v44 = vld.sshfl [vmem:[#allocation1 + $0x30] sm:$0xff pattern:$0x75316420]  ;;  %810 = vst [vmem:[#allocation1 + $0x21] ss:$2 sm:$0xff] %v613_v37  ;;  %v1146_v45 = vadd.f32 %v1145_v42, %v1144_v39  ;;  %v423_v37 = vunpack.c.l.bf16 %v2118_v24 }
  0x90   : > { %811 = vst [vmem:[#allocation1 + $0x30] ss:$2 sm:$0xff] %v403_v31  ;;  %v1147_v47 = vsel %vm1053_vm0, %v804_v44, 0.0  ;;  %v315_v38 = vld [vmem:[%s1948_s7 + $0x148] sm:$0xf] }
  0x91   : > { %812 = vst [vmem:[#allocation1 + $0x31] ss:$2 sm:$0xff] %v614_v30  ;;  %v1148_v50 = vadd.f32 %v1147_v47, %v1146_v45  ;;  %v419_v47 = vunpack.c.l.bf16 %v307_v33  ;;  %v316_v24 = vld [vmem:[%s1948_s7 + $0x14c] sm:$0x3] }
  0x92   : > { %v813_v14 = vld.sshfl [vmem:[#allocation1] sm:$0xff pattern:$0x75316420] }
  0x93   : > { %817 = vst [vmem:[#allocation1] ss:$2 sm:$0xff] %v404_v5  ;;  %v1149_v48 = vsel %vm1053_vm0, %v813_v14, 0.0  ;;  %v619_v5 = vrot.slane %v1653_v59, 4 }
  0x94   : > { %818 = vst [vmem:[#allocation1 + $0x1] ss:$2 sm:$0xff] %v1648_v9  ;;  %v814_v53 = vld.sshfl [vmem:[#allocation1 + $0x10] sm:$0xff pattern:$0x75316420]  ;;  %v1150_v55 = vadd.f32 %v1149_v48, %v1148_v50  ;;  %v411_v9 = vunpack.c.l.bf16 %v299_v0  ;;  %v624_v48 = vrot.slane %v1660_v41, 4 }
  0x95   : > { %819 = vst [vmem:[#allocation1 + $0x10] ss:$2 sm:$0xff] %v615_v43  ;;  %v1151_v56 = vsel %vm1053_vm0, %v814_v53, 0.0 }
  0x96   : > { %820 = vst [vmem:[#allocation1 + $0x11] ss:$2 sm:$0xff] %v1649_v46  ;;  %v1152_v60 = vadd.f32 %v1151_v56, %v1150_v55  ;;  %v815_v2 = vld.sshfl [vmem:[#allocation1 + $0x20] sm:$0xff pattern:$0x75316420]  ;;  %v620_v19 = vrot.slane %v411_v9, 4  ;;  %v416_v46 = vunpack.c.l.bf16 %v304_v28 }
  0x97   : > { %821 = vst [vmem:[#allocation1 + $0x20] ss:$2 sm:$0xff] %v616_v57  ;;  %v1153_v4 = vsel %vm1053_vm0, %v815_v2, 0.0  ;;  %v308_v55 = vld [vmem:[%s1948_s7 + $0x12c] sm:$0x3] }
  0x98   : > { %v816_v3 = vld.sshfl [vmem:[#allocation1 + $0x30] sm:$0xff pattern:$0x75316420]  ;;  %822 = vst [vmem:[#allocation1 + $0x21] ss:$2 sm:$0xff] %v407_v52  ;;  %v1154_v7 = vadd.f32 %v1153_v4, %v1152_v60  ;;  %v626_v52 = vrot.slane %v419_v47, 4  ;;  %v420_v0 = vunpack.c.l.bf16 %v308_v55 }
  0x99   : > { %v1155_v8 = vsel %vm1053_vm0, %v816_v3, 0.0  ;;  %823 = vst [vmem:[#allocation1 + $0x30] ss:$2 sm:$0xff] %v617_v62  ;;  %v324_v28 = vld [vmem:[%s1948_s7 + $0x16c] sm:$0x3] }
  0x9a   : > { %824 = vst [vmem:[#allocation1 + $0x31] ss:$2 sm:$0xff] %v408_v1  ;;  %v1156_v12 = vadd.f32 %v1155_v8, %v1154_v7  ;;  %v320_v7 = vld [vmem:[%s1948_s7 + $0x15c] sm:$0x3]  ;;  %v1717_v8 = vld [vmem:[%s1948_s7 + $0x140] sm:$0xff]  }
  0x9b   : > { %v825_v36 = vld.sshfl [vmem:[#allocation1] sm:$0xff pattern:$0x75316420] }
  0x9c   : > { %829 = vst [vmem:[#allocation1] ss:$2 sm:$0xff] %v1652_v20  ;;  %v1157_v10 = vsel %vm1053_vm0, %v825_v36, 0.0  ;;  %v303_v20 = vld [vmem:[%s1948_s7 + $0x118] sm:$0xf] }
  0x9d   : > { %830 = vst [vmem:[#allocation1 + $0x1] ss:$2 sm:$0xff] %v618_v29  ;;  %v826_v11 = vld.sshfl [vmem:[#allocation1 + $0x10] sm:$0xff pattern:$0x75316420]  ;;  %v1158_v17 = vadd.f32 %v1157_v10, %v1156_v12  ;;  %v415_v29 = vunpack.c.l.bf16 %v303_v20  ;;  %v629_v20 = vrot.slane %v423_v37, 4 }
  0x9e   : > { %831 = vst [vmem:[#allocation1 + $0x10] ss:$2 sm:$0xff] %v1653_v59  ;;  %v1159_v14 = vsel %vm1053_vm0, %v826_v11, 0.0  ;;  %v1664_v59 = vunpack.c.l.bf16 %v2113_v15  ;;  %v312_v12 = vld [vmem:[%s1948_s7 + $0x13c] sm:$0x3] }
  0x9f   : > { %832 = vst [vmem:[#allocation1 + $0x11] ss:$2 sm:$0xff] %v619_v5  ;;  %v1160_v22 = vadd.f32 %v1159_v14, %v1158_v17  ;;  %v827_v23 = vld.sshfl [vmem:[#allocation1 + $0x20] sm:$0xff pattern:$0x75316420]  ;;  %v623_v44 = vrot.slane %v415_v29, 4  ;;  %v1668_v17 = vunpack.c.l.bf16 %v1717_v8 }
  0xa0   : > { %833 = vst [vmem:[#allocation1 + $0x20] ss:$2 sm:$0xff] %v411_v9  ;;  %v1161_v26 = vsel %vm1053_vm0, %v827_v23, 0.0  ;;  %v627_v3 = vrot.slane %v1664_v59, 4  ;;  %v1669_v23 = vunpack.c.h.bf16 %v1717_v8 }
  0xa1   : > { %v828_v31 = vld.sshfl [vmem:[#allocation1 + $0x30] sm:$0xff pattern:$0x75316420]  ;;  %834 = vst [vmem:[#allocation1 + $0x21] ss:$2 sm:$0xff] %v620_v19  ;;  %v1162_v32 = vadd.f32 %v1161_v26, %v1160_v22  ;;  %v630_v15 = vrot.slane %v1668_v17, 4 }
  0xa2   : > { %835 = vst [vmem:[#allocation1 + $0x30] ss:$2 sm:$0xff] %v412_v21  ;;  %v1163_v35 = vsel %vm1053_vm0, %v828_v31, 0.0  ;;  %v631_v33 = vrot.slane %v1669_v23, 4 }
  0xa3   : > { %836 = vst [vmem:[#allocation1 + $0x31] ss:$2 sm:$0xff] %v1656_v40  ;;  %v1164_v30 = vadd.f32 %v1163_v35, %v1162_v32  ;;  %v427_v40 = vunpack.c.l.bf16 %v315_v38 }
  0xa4   : > { %v837_v58 = vld.sshfl [vmem:[#allocation1] sm:$0xff pattern:$0x75316420] }
  0xa5   : > { %841 = vst [vmem:[#allocation1] ss:$2 sm:$0xff] %v621_v49  ;;  %v1165_v36 = vsel %vm1053_vm0, %v837_v58, 0.0  ;;  %v632_v58 = vrot.slane %v427_v40, 4 }
  0xa6   : > { %842 = vst [vmem:[#allocation1 + $0x1] ss:$2 sm:$0xff] %v1657_v51  ;;  %v838_v39 = vld.sshfl [vmem:[#allocation1 + $0x10] sm:$0xff pattern:$0x75316420]  ;;  %v1166_v45 = vadd.f32 %v1165_v36, %v1164_v30 }
  0xa7   : > { %843 = vst [vmem:[#allocation1 + $0x10] ss:$2 sm:$0xff] %v622_v25  ;;  %v1167_v42 = vsel %vm1053_vm0, %v838_v39, 0.0  ;;  %v2137_v51 = vld [vmem:[%s1948_s7 + $0x158] sm:$0xf]  ;;  %v424_v25 = vunpack.c.l.bf16 %v312_v12  ;;  %v436_v39 = vunpack.c.l.bf16 %v324_v28 }
  0xa8   : > { %844 = vst [vmem:[#allocation1 + $0x11] ss:$2 sm:$0xff] %v415_v29  ;;  %v1168_v34 = vadd.f32 %v1167_v42, %v1166_v45  ;;  %v839_v49 = vld.sshfl [vmem:[#allocation1 + $0x20] sm:$0xff pattern:$0x75316420]  ;;  %v431_v2 = vunpack.c.l.bf16 %v2137_v51  ;;  %v2160_v29 = vld [vmem:[%s1948_s7 + $0x170] sm:$0xff]   ;;  %v428_v45 = vunpack.c.l.bf16 %v316_v24 }
  0xa9   : > { %845 = vst [vmem:[#allocation1 + $0x20] ss:$2 sm:$0xff] %v623_v44  ;;  %v1169_v50 = vsel %vm1053_vm0, %v839_v49, 0.0  ;;  %v1680_v42 = vunpack.c.l.bf16 %v2160_v29  ;;  %v328_v24 = vld [vmem:[%s1948_s7 + $0x17c] sm:$0x3] }
  0xaa   : > { %v840_v53 = vld.sshfl [vmem:[#allocation1 + $0x30] sm:$0xff pattern:$0x75316420]  ;;  %846 = vst [vmem:[#allocation1 + $0x21] ss:$2 sm:$0xff] %v416_v46  ;;  %v1170_v54 = vadd.f32 %v1169_v50, %v1168_v34  ;;  %v635_v10 = vrot.slane %v431_v2, 4 }
  0xab   : > { %847 = vst [vmem:[#allocation1 + $0x30] ss:$2 sm:$0xff] %v1660_v41  ;;  %v1171_v56 = vsel %vm1053_vm0, %v840_v53, 0.0  ;;  %v2169_v46 = vld [vmem:[%s1948_s7 + $0x180] sm:$0xff]  }
  0xac   : > { %848 = vst [vmem:[#allocation1 + $0x31] ss:$2 sm:$0xff] %v624_v48  ;;  %v1172_v61 = vadd.f32 %v1171_v56, %v1170_v54  ;;  %v1719_v48 = vld [vmem:[%s1948_s7 + $0x160] sm:$0xff]   ;;  %v1684_v50 = vunpack.c.l.bf16 %v2169_v46 }
  0xad   : > { %v849_v16 = vld.sshfl [vmem:[#allocation1] sm:$0xff pattern:$0x75316420]  ;;  %v1676_v56 = vunpack.c.l.bf16 %v1719_v48 }
  0xae   : > { %853 = vst [vmem:[#allocation1] ss:$2 sm:$0xff] %v1661_v63  ;;  %v1173_v57 = vsel %vm1053_vm0, %v849_v16, 0.0  ;;  %v432_v16 = vunpack.c.l.bf16 %v320_v7 }
  0xaf   : > { %854 = vst [vmem:[#allocation1 + $0x1] ss:$2 sm:$0xff] %v625_v6  ;;  %v850_v60 = vld.sshfl [vmem:[#allocation1 + $0x10] sm:$0xff pattern:$0x75316420]  ;;  %v1174_v1 = vadd.f32 %v1173_v57, %v1172_v61  ;;  %v642_v61 = vrot.slane %v1684_v50, 4 }
  0xb0   : > { %855 = vst [vmem:[#allocation1 + $0x10] ss:$2 sm:$0xff] %v419_v47  ;;  %v1175_v62 = vsel %vm1053_vm0, %v850_v60, 0.0  ;;  %v323_v57 = vld [vmem:[%s1948_s7 + $0x168] sm:$0xf]  ;;  %v636_v7 = vrot.slane %v1676_v56, 4 }
  0xb1   : > { %856 = vst [vmem:[#allocation1 + $0x11] ss:$2 sm:$0xff] %v626_v52  ;;  %v1176_v4 = vadd.f32 %v1175_v62, %v1174_v1  ;;  %v851_v5 = vld.sshfl [vmem:[#allocation1 + $0x20] sm:$0xff pattern:$0x75316420]  ;;  %v1677_v62 = vunpack.c.h.bf16 %v1719_v48  ;;  %v2179_v1 = vld [vmem:[%s1948_s7 + $0x190] sm:$0xff]  }
  0xb2   : > { %857 = vst [vmem:[#allocation1 + $0x20] ss:$2 sm:$0xff] %v420_v0  ;;  %v1177_v9 = vsel %vm1053_vm0, %v851_v5, 0.0  ;;  %v435_v5 = vunpack.c.l.bf16 %v323_v57 }
  0xb3   : > { %v852_v6 = vld.sshfl [vmem:[#allocation1 + $0x30] sm:$0xff pattern:$0x75316420]  ;;  %858 = vst [vmem:[#allocation1 + $0x21] ss:$2 sm:$0xff] %v1664_v59  ;;  %v1178_v11 = vadd.f32 %v1177_v9, %v1176_v4  ;;  %v1688_v9 = vunpack.c.l.bf16 %v2179_v1 }
  0xb4   : > { %859 = vst [vmem:[#allocation1 + $0x30] ss:$2 sm:$0xff] %v627_v3  ;;  %v1179_v13 = vsel %vm1053_vm0, %v852_v6, 0.0  ;;  %v638_v12 = vrot.slane %v435_v5, 4 }
  0xb5   : > { %860 = vst [vmem:[#allocation1 + $0x31] ss:$2 sm:$0xff] %v1665_v18  ;;  %v1180_v19 = vadd.f32 %v1179_v13, %v1178_v11  ;;  %v1718_v18 = vld [vmem:[%s1948_s7 + $0x150] sm:$0xff]  }
  0xb6   : > { %v861_v43 = vld.sshfl [vmem:[#allocation1] sm:$0xff pattern:$0x75316420]  ;;  %v1672_v30 = vunpack.c.l.bf16 %v1718_v18  ;;  %v1673_v44 = vunpack.c.h.bf16 %v1718_v18 }
  0xb7   : > { %865 = vst [vmem:[#allocation1] ss:$2 sm:$0xff] %v628_v27  ;;  %v1181_v14 = vsel %vm1053_vm0, %v861_v43, 0.0 }
  0xb8   : > { %866 = vst [vmem:[#allocation1 + $0x1] ss:$2 sm:$0xff] %v423_v37  ;;  %v862_v21 = vld.sshfl [vmem:[#allocation1 + $0x10] sm:$0xff pattern:$0x75316420]  ;;  %v1182_v26 = vadd.f32 %v1181_v14, %v1180_v19  ;;  %v634_v52 = vrot.slane %v1673_v44, 4  ;;  %v1689_v19 = vunpack.c.h.bf16 %v2179_v1 }
  0xb9   : > { %v1183_v27 = vsel %vm1053_vm0, %v862_v21, 0.0  ;;  %867 = vst [vmem:[#allocation1 + $0x10] ss:$2 sm:$0xff] %v629_v20  ;;  %v645_v14 = vrot.slane %v1688_v9, 4  ;;  %v327_v20 = vld [vmem:[%s1948_s7 + $0x178] sm:$0xf] }
  0xba   : > { %v1184_v31 = vadd.f32 %v1183_v27, %v1182_v26  ;;  %v863_v32 = vld.sshfl [vmem:[#allocation1 + $0x20] sm:$0xff pattern:$0x75316420]  ;;  %868 = vst [vmem:[#allocation1 + $0x11] ss:$2 sm:$0xff] %v424_v25  ;;  %v639_v25 = vrot.slane %v1680_v42, 4  ;;  %v439_v28 = vunpack.c.l.bf16 %v327_v20 }
  0xbb   : > { %v1185_v35 = vsel %vm1053_vm0, %v863_v32, 0.0  ;;  %869 = vst [vmem:[#allocation1 + $0x20] ss:$2 sm:$0xff] %v1668_v17 }
  0xbc   : > { %v864_v36 = vld.sshfl [vmem:[#allocation1 + $0x30] sm:$0xff pattern:$0x75316420]  ;;  %v1186_v37 = vadd.f32 %v1185_v35, %v1184_v31  ;;  %870 = vst [vmem:[#allocation1 + $0x21] ss:$2 sm:$0xff] %v630_v15  ;;  %v2196_v31 = vld [vmem:[%s1948_s7 + $0x1a0] sm:$0xff]  }
  0xbd   : > { %v1187_v38 = vsel %vm1053_vm0, %v864_v36, 0.0  ;;  %871 = vst [vmem:[#allocation1 + $0x30] ss:$2 sm:$0xff] %v1669_v23  ;;  %v1681_v23 = vunpack.c.h.bf16 %v2160_v29  ;;  %v1693_v32 = vunpack.c.h.bf16 %v2196_v31 }
  0xbe   : > { %v1188_v43 = vadd.f32 %v1187_v38, %v1186_v37  ;;  %872 = vst [vmem:[#allocation1 + $0x31] ss:$2 sm:$0xff] %v631_v33  ;;  %v1862_v37 = vmov 0.0  }
  0xbf   : > { %v873_v63 = vld.sshfl [vmem:[#allocation1] sm:$0xff pattern:$0x75316420]  ;;  %v640_v33 = vrot.slane %v1681_v23, 4  ;;  %232 = vst.msk [vmem:[#allocation2] sm:$0x1] %vm231_vm1, %v1862_v37 }
  0xc0   : > { %877 = vst [vmem:[#allocation1] ss:$2 sm:$0xff] %v427_v40  ;;  %v1189_v41 = vsel %vm1053_vm0, %v873_v63, 0.0  ;;  %v633_v40 = vrot.slane %v1672_v30, 4 }
  0xc1   : > { %878 = vst [vmem:[#allocation1 + $0x1] ss:$2 sm:$0xff] %v632_v58  ;;  %v1190_v34 = vadd.f32 %v1189_v41, %v1188_v43  ;;  %v874_v49 = vld.sshfl [vmem:[#allocation1 + $0x10] sm:$0xff pattern:$0x75316420]  ;;  %v649_v43 = vrot.slane %v1693_v32, 4 }
  0xc2   : > { %879 = vst [vmem:[#allocation1 + $0x10] ss:$2 sm:$0xff] %v428_v45  ;;  %v1191_v53 = vsel %vm1053_vm0, %v874_v49, 0.0 }
  0xc3   : > { %v875_v54 = vld.sshfl [vmem:[#allocation1 + $0x20] sm:$0xff pattern:$0x75316420]  ;;  %880 = vst [vmem:[#allocation1 + $0x11] ss:$2 sm:$0xff] %v1672_v30  ;;  %v1192_v55 = vadd.f32 %v1191_v53, %v1190_v34  ;;  %v641_v30 = vrot.slane %v439_v28, 4 }
  0xc4   : > { %881 = vst [vmem:[#allocation1 + $0x20] ss:$2 sm:$0xff] %v633_v40  ;;  %v1193_v58 = vsel %vm1053_vm0, %v875_v54, 0.0  ;;  %v2216_v54 = vld [vmem:[%s1948_s7 + $0x1b8] sm:$0xf] }
  0xc5   : > { %v876_v59 = vld.sshfl [vmem:[#allocation1 + $0x30] sm:$0xff pattern:$0x75316420]  ;;  %882 = vst [vmem:[#allocation1 + $0x21] ss:$2 sm:$0xff] %v1673_v44  ;;  %v1194_v60 = vadd.f32 %v1193_v58, %v1192_v55  ;;  %v1685_v44 = vunpack.c.h.bf16 %v2169_v46 }
  0xc6   : > { %883 = vst [vmem:[#allocation1 + $0x30] ss:$2 sm:$0xff] %v634_v52  ;;  %v1195_v63 = vsel %vm1053_vm0, %v876_v59, 0.0  ;;  %v332_v55 = vld [vmem:[%s1948_s7 + $0x18c] sm:$0x3] }
  0xc7   : > { %884 = vst [vmem:[#allocation1 + $0x31] ss:$2 sm:$0xff] %v431_v2  ;;  %v1196_v3 = vadd.f32 %v1195_v63, %v1194_v60  ;;  %v643_v52 = vrot.slane %v1685_v44, 4  ;;  %v335_v58 = vld [vmem:[%s1948_s7 + $0x198] sm:$0xf]  ;;  %v455_v63 = vunpack.c.l.bf16 %v2216_v54 }
  0xc8   : > { %v885_v22 = vld.sshfl [vmem:[#allocation1] sm:$0xff pattern:$0x75316420] }
  0xc9   : > { %889 = vst [vmem:[#allocation1] ss:$2 sm:$0xff] %v635_v10  ;;  %v1197_v0 = vsel %vm1053_vm0, %v885_v22, 0.0  ;;  %v637_v10 = vrot.slane %v1677_v62, 4 }
  0xca   : > { %890 = vst [vmem:[#allocation1 + $0x1] ss:$2 sm:$0xff] %v432_v16  ;;  %v1198_v8 = vadd.f32 %v1197_v0, %v1196_v3  ;;  %v886_v6 = vld.sshfl [vmem:[#allocation1 + $0x10] sm:$0xff pattern:$0x75316420]  ;;  %v444_v3 = vunpack.c.l.bf16 %v332_v55 }
  0xcb   : > { %891 = vst [vmem:[#allocation1 + $0x10] ss:$2 sm:$0xff] %v1676_v56  ;;  %v1199_v11 = vsel %vm1053_vm0, %v886_v6, 0.0 }
  0xcc   : > { %v887_v13 = vld.sshfl [vmem:[#allocation1 + $0x20] sm:$0xff pattern:$0x75316420]  ;;  %892 = vst [vmem:[#allocation1 + $0x11] ss:$2 sm:$0xff] %v636_v7  ;;  %v1200_v51 = vadd.f32 %v1199_v11, %v1198_v8 }
  0xcd   : > { %893 = vst [vmem:[#allocation1 + $0x20] ss:$2 sm:$0xff] %v1677_v62  ;;  %v1201_v2 = vsel %vm1053_vm0, %v887_v13, 0.0  ;;  %v336_v8 = vld [vmem:[%s1948_s7 + $0x19c] sm:$0x3] }
  0xce   : > { %v888_v16 = vld.sshfl [vmem:[#allocation1 + $0x30] sm:$0xff pattern:$0x75316420]  ;;  %894 = vst [vmem:[#allocation1 + $0x21] ss:$2 sm:$0xff] %v637_v10  ;;  %v1202_v17 = vadd.f32 %v1201_v2, %v1200_v51  ;;  %v646_v10 = vrot.slane %v1689_v19, 4 }
  0xcf   : > { %895 = vst [vmem:[#allocation1 + $0x30] ss:$2 sm:$0xff] %v435_v5  ;;  %v1203_v21 = vsel %vm1053_vm0, %v888_v16, 0.0  ;;  %v339_v13 = vld [vmem:[%s1948_s7 + $0x1a8] sm:$0xf] }
  0xd0   : > { %896 = vst [vmem:[#allocation1 + $0x31] ss:$2 sm:$0xff] %v638_v12  ;;  %v1204_v26 = vadd.f32 %v1203_v21, %v1202_v17  ;;  %v1692_v17 = vunpack.c.l.bf16 %v2196_v31 }
  0xd1   : > { %v897_v47 = vld.sshfl [vmem:[#allocation1] sm:$0xff pattern:$0x75316420] }
  0xd2   : > { %901 = vst [vmem:[#allocation1] ss:$2 sm:$0xff] %v436_v39  ;;  %v1205_v22 = vsel %vm1053_vm0, %v897_v47, 0.0  ;;  %v331_v39 = vld [vmem:[%s1948_s7 + $0x188] sm:$0xf]  ;;  %v440_v47 = vunpack.c.l.bf16 %v328_v24 }
  0xd3   : > { %902 = vst [vmem:[#allocation1 + $0x1] ss:$2 sm:$0xff] %v1680_v42  ;;  %v1206_v15 = vadd.f32 %v1205_v22, %v1204_v26  ;;  %v898_v18 = vld.sshfl [vmem:[#allocation1 + $0x10] sm:$0xff pattern:$0x75316420]  ;;  %v443_v49 = vunpack.c.l.bf16 %v331_v39  ;;  %v1263_v22 = vld [vmem:[%s2500_s1] sm:$0xff] }
  0xd4   : > { %903 = vst [vmem:[#allocation1 + $0x10] ss:$2 sm:$0xff] %v639_v25  ;;  %v1207_v29 = vsel %vm1053_vm0, %v898_v18, 0.0  ;;  %v340_v26 = vld [vmem:[%s1948_s7 + $0x1ac] sm:$0x3] }
  0xd5   : > { %v899_v35 = vld.sshfl [vmem:[#allocation1 + $0x20] sm:$0xff pattern:$0x75316420]  ;;  %v1208_v36 = vadd.f32 %v1207_v29, %v1206_v15  ;;  %904 = vst [vmem:[#allocation1 + $0x11] ss:$2 sm:$0xff] %v1681_v23  ;;  %v644_v56 = vrot.slane %v443_v49, 4  ;;  %v451_v23 = vunpack.c.l.bf16 %v339_v13 }
  0xd6   : > { %v1209_v38 = vsel %vm1053_vm0, %v899_v35, 0.0  ;;  %905 = vst [vmem:[#allocation1 + $0x20] ss:$2 sm:$0xff] %v640_v33 }
  0xd7   : > { %v900_v41 = vld.sshfl [vmem:[#allocation1 + $0x30] sm:$0xff pattern:$0x75316420]  ;;  %v1210_v42 = vadd.f32 %v1209_v38, %v1208_v36  ;;  %906 = vst [vmem:[#allocation1 + $0x21] ss:$2 sm:$0xff] %v439_v28  ;;  %v650_v15 = vrot.slane %v451_v23, 4 }
  0xd8   : > { %v1211_v45 = vsel %vm1053_vm0, %v900_v41, 0.0  ;;  %907 = vst [vmem:[#allocation1 + $0x30] ss:$2 sm:$0xff] %v641_v30  ;;  %v344_v30 = vld [vmem:[%s1948_s7 + $0x1bc] sm:$0x3] }
  0xd9   : > { %v1212_v34 = vadd.f32 %v1211_v45, %v1210_v42  ;;  %908 = vst [vmem:[#allocation1 + $0x31] ss:$2 sm:$0xff] %v440_v47  ;;  %v653_v45 = vrot.slane %v455_v63, 4 }
  0xda   : > { %v909_v4 = vld.sshfl [vmem:[#allocation1] sm:$0xff pattern:$0x75316420] }
  0xdb   : > { %913 = vst [vmem:[#allocation1] ss:$2 sm:$0xff] %v1684_v50  ;;  %v1213_v40 = vsel %vm1053_vm0, %v909_v4, 0.0  ;;  %v2212_v50 = vld [vmem:[%s1948_s7 + $0x1b0] sm:$0xff]   ;;  %v447_v4 = vunpack.c.l.bf16 %v335_v58 }
  0xdc   : > { %914 = vst [vmem:[#allocation1 + $0x1] ss:$2 sm:$0xff] %v642_v61  ;;  %v1697_v46 = vunpack.c.h.bf16 %v2212_v50  ;;  %v1214_v53 = vadd.f32 %v1213_v40, %v1212_v34  ;;  %v910_v57 = vld.sshfl [vmem:[#allocation1 + $0x10] sm:$0xff pattern:$0x75316420]  ;;  %v1696_v18 = vunpack.c.l.bf16 %v2212_v50  ;;  %v456_v34 = vunpack.c.l.bf16 %v344_v30 }
  0xdd   : > { %915 = vst [vmem:[#allocation1 + $0x10] ss:$2 sm:$0xff] %v1685_v44  ;;  %v1215_v59 = vsel %vm1053_vm0, %v910_v57, 0.0  ;;  %v647_v51 = vrot.slane %v447_v4, 4  ;;  %v1386_v50 = vld [vmem:[%s2502_s3 + $0x1f0] sm:$0xff] }
  0xde   : > { %v652_v60 = vrot.slane %v1697_v46, 4  ;;  %v911_v61 = vld.sshfl [vmem:[#allocation1 + $0x20] sm:$0xff pattern:$0x75316420]  ;;  %916 = vst [vmem:[#allocation1 + $0x11] ss:$2 sm:$0xff] %v643_v52  ;;  %v1216_v62 = vadd.f32 %v1215_v59, %v1214_v53  ;;  %1408 = vmatpush.msra.mxu3 %v1386_v50 }
  0xdf   : > { %917 = vst [vmem:[#allocation1 + $0x20] ss:$2 sm:$0xff] %v443_v49  ;;  %v1217_v0 = vsel %vm1053_vm0, %v911_v61, 0.0  ;;  %v651_v38 = vrot.slane %v1696_v18, 4  ;;  %v1354_v61 = vld [vmem:[%s2502_s3 + $0xf0] sm:$0xff]  ;;  %v1331_v50 = vld [vmem:[%s2502_s3 + $0x38] sm:$0xff] }
  0xe0   : > { %918 = vst [vmem:[#allocation1 + $0x21] ss:$2 sm:$0xff] %v644_v56  ;;  %v1218_v5 = vadd.f32 %v1217_v0, %v1216_v62  ;;  %v912_v6 = vld.sshfl [vmem:[#allocation1 + $0x30] sm:$0xff pattern:$0x75316420]  ;;  %1388 = vmatpush.msra.mxu2 %v1354_v61  ;;  %v1387_v0 = vld [vmem:[%s2502_s3 + $0x1f8] sm:$0xff] }
  0xe1   : > { %v1219_v11 = vsel %vm1053_vm0, %v912_v6, 0.0  ;;  %919 = vst [vmem:[#allocation1 + $0x30] ss:$2 sm:$0xff] %v444_v3  ;;  %v1352_v3 = vld [vmem:[%s2502_s3 + $0xe0] sm:$0xff]  ;;  %v1385_v6 = vld [vmem:[%s2502_s3 + $0x1e8] sm:$0xff]  ;;  %v1338_v30 = vld [vmem:[%s2502_s3 + $0x70] sm:$0xff] }
  0xe2   : > { %v1220_v2 = vadd.f32 %v1219_v11, %v1218_v5  ;;  %920 = vst [vmem:[#allocation1 + $0x31] ss:$2 sm:$0xff] %v1688_v9  ;;  %1389 = vmatpush.msra.mxu2 %v1352_v3  ;;  %v1350_v11 = vld [vmem:[%s2502_s3 + $0xd0] sm:$0xff]  ;;  %v1360_v3 = vld [vmem:[%s2502_s3 + $0x120] sm:$0xff] }
  0xe3   : > { %v2193_v27 = vld.sshfl [vmem:[#allocation1] sm:$0xff pattern:$0x75316420]  ;;  %v1362_v61 = vld [vmem:[%s2502_s3 + $0x130] sm:$0xff] }
  0xe4   : > { %925 = vst [vmem:[#allocation1] ss:$2 sm:$0xff] %v645_v14  ;;  %v1221_v12 = vsel %vm1053_vm0, %v2193_v27, 0.0  ;;  %v448_v14 = vunpack.c.l.bf16 %v336_v8  ;;  %v648_v27 = vrot.slane %v1692_v17, 4  ;;  %v1353_v8 = vld [vmem:[%s2502_s3 + $0xe8] sm:$0xff]  ;;  %1390 = vmatpush.msra.mxu2 %v1350_v11  ;;  %v1324_v11 = vld [vmem:[%s2502_s3] sm:$0xff] }
  0xe5   : > { %926 = vst [vmem:[#allocation1 + $0x1] ss:$2 sm:$0xff] %v1689_v19  ;;  %v922_v16 = vld.sshfl [vmem:[#allocation1 + $0x10] sm:$0xff pattern:$0x75316420]  ;;  %v1222_v19 = vadd.f32 %v1221_v12, %v1220_v2  ;;  %v1383_v2 = vld [vmem:[%s2502_s3 + $0x1d8] sm:$0xff] }
  0xe6   : > { %927 = vst [vmem:[#allocation1 + $0x10] ss:$2 sm:$0xff] %v646_v10  ;;  %v1223_v20 = vsel %vm1053_vm0, %v922_v16, 0.0  ;;  %v1382_v12 = vld [vmem:[%s2502_s3 + $0x1d0] sm:$0xff]  ;;  %v1380_v16 = vld [vmem:[%s2502_s3 + $0x1c0] sm:$0xff] }
  0xe7   : > { %v923_v21 = vld.sshfl [vmem:[#allocation1 + $0x20] sm:$0xff pattern:$0x75316420]  ;;  %928 = vst [vmem:[#allocation1 + $0x11] ss:$2 sm:$0xff] %v447_v4  ;;  %v1224_v25 = vadd.f32 %v1223_v20, %v1222_v19  ;;  %v1381_v19 = vld [vmem:[%s2502_s3 + $0x1c8] sm:$0xff] }
  0xe8   : > { %929 = vst [vmem:[#allocation1 + $0x20] ss:$2 sm:$0xff] %v647_v51  ;;  %v1225_v1 = vsel %vm1053_vm0, %v923_v21, 0.0  ;;  %v1351_v51 = vld [vmem:[%s2502_s3 + $0xd8] sm:$0xff]  ;;  %v1346_v21 = vld [vmem:[%s2502_s3 + $0xb0] sm:$0xff] }
  0xe9   : > { %930 = vst [vmem:[#allocation1 + $0x21] ss:$2 sm:$0xff] %v448_v14  ;;  %v1226_v28 = vadd.f32 %v1225_v1, %v1224_v25  ;;  %v924_v31 = vld.sshfl [vmem:[#allocation1 + $0x30] sm:$0xff pattern:$0x75316420]  ;;  %v1348_v14 = vld [vmem:[%s2502_s3 + $0xc0] sm:$0xff] }
  0xea   : > { %931 = vst [vmem:[#allocation1 + $0x30] ss:$2 sm:$0xff] %v1692_v17  ;;  %v1227_v24 = vsel %vm1053_vm0, %v924_v31, 0.0  ;;  %v1349_v17 = vld [vmem:[%s2502_s3 + $0xc8] sm:$0xff]  ;;  %1391 = vmatpush.msra.mxu2 %v1348_v14  ;;  %v1379_v25 = vld [vmem:[%s2502_s3 + $0x1b8] sm:$0xff]  ;;  %v1342_v31 = vld [vmem:[%s2502_s3 + $0x90] sm:$0xff] }
  0xeb   : > { %932 = vst [vmem:[#allocation1 + $0x31] ss:$2 sm:$0xff] %v648_v27  ;;  %v1228_v35 = vadd.f32 %v1227_v24, %v1226_v28  ;;  %v1345_v27 = vld [vmem:[%s2502_s3 + $0xa8] sm:$0xff]  ;;  %v1375_v24 = vld [vmem:[%s2502_s3 + $0x198] sm:$0xff] }
  0xec   : > { %v2209_v48 = vld.sshfl [vmem:[#allocation1] sm:$0xff pattern:$0x75316420]  ;;  %1392 = vmatpush.msra.mxu2 %v1346_v21  ;;  %v1377_v28 = vld [vmem:[%s2502_s3 + $0x1a8] sm:$0xff] }
  0xed   : > { %937 = vst [vmem:[#allocation1] ss:$2 sm:$0xff] %v1693_v32  ;;  %v452_v32 = vunpack.c.l.bf16 %v340_v26  ;;  %v1229_v33 = vsel %vm1053_vm0, %v2209_v48, 0.0  ;;  %v1376_v26 = vld [vmem:[%s2502_s3 + $0x1a0] sm:$0xff] }
  0xee   : > { %938 = vst [vmem:[#allocation1 + $0x1] ss:$2 sm:$0xff] %v649_v43  ;;  %v934_v29 = vld.sshfl [vmem:[#allocation1 + $0x10] sm:$0xff pattern:$0x75316420]  ;;  %v1230_v39 = vadd.f32 %v1229_v33, %v1228_v35  ;;  %v1372_v35 = vld [vmem:[%s2502_s3 + $0x180] sm:$0xff] }
  0xef   : > { %939 = vst [vmem:[#allocation1 + $0x10] ss:$2 sm:$0xff] %v451_v23  ;;  %v1231_v36 = vsel %vm1053_vm0, %v934_v29, 0.0  ;;  %v1347_v23 = vld [vmem:[%s2502_s3 + $0xb8] sm:$0xff]  ;;  %v1340_v29 = vld [vmem:[%s2502_s3 + $0x80] sm:$0xff] }
  0xf0   : > { %v935_v37 = vld.sshfl [vmem:[#allocation1 + $0x20] sm:$0xff pattern:$0x75316420]  ;;  %940 = vst [vmem:[#allocation1 + $0x11] ss:$2 sm:$0xff] %v650_v15  ;;  %v1232_v44 = vadd.f32 %v1231_v36, %v1230_v39  ;;  %v1341_v36 = vld [vmem:[%s2502_s3 + $0x88] sm:$0xff] }
  0xf1   : > { %941 = vst [vmem:[#allocation1 + $0x20] ss:$2 sm:$0xff] %v452_v32  ;;  %v1233_v41 = vsel %vm1053_vm0, %v935_v37, 0.0  ;;  %v1343_v32 = vld [vmem:[%s2502_s3 + $0x98] sm:$0xff]  ;;  %v1373_v37 = vld [vmem:[%s2502_s3 + $0x188] sm:$0xff] }
  0xf2   : > { %942 = vst [vmem:[#allocation1 + $0x21] ss:$2 sm:$0xff] %v1696_v18  ;;  %v1234_v47 = vadd.f32 %v1233_v41, %v1232_v44  ;;  %v936_v40 = vld.sshfl [vmem:[#allocation1 + $0x30] sm:$0xff pattern:$0x75316420]  ;;  %v1339_v41 = vld [vmem:[%s2502_s3 + $0x78] sm:$0xff] }
  0xf3   : > { %943 = vst [vmem:[#allocation1 + $0x30] ss:$2 sm:$0xff] %v651_v38  ;;  %v1235_v48 = vsel %vm1053_vm0, %v936_v40, 0.0  ;;  %v1374_v18 = vld [vmem:[%s2502_s3 + $0x190] sm:$0xff]  ;;  %v1336_v44 = vld [vmem:[%s2502_s3 + $0x60] sm:$0xff]  ;;  %v1369_v40 = vld [vmem:[%s2502_s3 + $0x168] sm:$0xff] }
  0xf4   : > { %944 = vst [vmem:[#allocation1 + $0x31] ss:$2 sm:$0xff] %v1697_v46  ;;  %v1236_v53 = vadd.f32 %v1235_v48, %v1234_v47  ;;  %v1370_v38 = vld [vmem:[%s2502_s3 + $0x170] sm:$0xff]  ;;  %v457_v47 = vld [vmem:[#allocation2] sm:$0x1] }
  0xf5   : > { %v2225_v7 = vld.sshfl [vmem:[#allocation1] sm:$0xff pattern:$0x75316420] }
  0xf6   : > { %949 = vst [vmem:[#allocation1] ss:$2 sm:$0xff] %v652_v60  ;;  %v1237_v49 = vsel %vm1053_vm0, %v2225_v7, 0.0  ;;  %v1384_v7 = vld [vmem:[%s2502_s3 + $0x1e0] sm:$0xff] }
  0xf7   : > { %950 = vst [vmem:[#allocation1 + $0x1] ss:$2 sm:$0xff] %v455_v63  ;;  %v946_v52 = vld.sshfl [vmem:[#allocation1 + $0x10] sm:$0xff pattern:$0x75316420]  ;;  %v1238_v54 = vadd.f32 %v1237_v49, %v1236_v53  ;;  %v1355_v63 = vld [vmem:[%s2502_s3 + $0xf8] sm:$0xff]  ;;  %1409 = vmatpush.msra.mxu3 %v1384_v7 }
  0xf8   : > { %951 = vst [vmem:[#allocation1 + $0x10] ss:$2 sm:$0xff] %v653_v45  ;;  %v1239_v55 = vsel %vm1053_vm0, %v946_v52, 0.0  ;;  %v1368_v45 = vld [vmem:[%s2502_s3 + $0x160] sm:$0xff]  ;;  %v1334_v49 = vld [vmem:[%s2502_s3 + $0x50] sm:$0xff]  ;;  %v1335_v53 = vld [vmem:[%s2502_s3 + $0x58] sm:$0xff] }
  0xf9   : > { %952 = vst [vmem:[#allocation1 + $0x11] ss:$2 sm:$0xff] %v456_v34  ;;  %v947_v56 = vld.sshfl [vmem:[#allocation1 + $0x20] sm:$0xff pattern:$0x75316420]  ;;  %v1240_v57 = vadd.f32 %v1239_v55, %v1238_v54  ;;  %1410 = vmatpush.msra.mxu3 %v1382_v12  ;;  %v1337_v34 = vld [vmem:[%s2502_s3 + $0x68] sm:$0xff] }
  0xfa   : > { %v1241_v58 = vsel %vm1053_vm0, %v947_v56, 0.0  ;;  %v1366_v52 = vld [vmem:[%s2502_s3 + $0x150] sm:$0xff]  ;;  %v1367_v55 = vld [vmem:[%s2502_s3 + $0x158] sm:$0xff]  ;;  %v1332_v56 = vld [vmem:[%s2502_s3 + $0x40] sm:$0xff] }
  0xfb   : > { %v1242_v59 = vadd.f32 %v1241_v58, %v1240_v57  ;;  %v948_v60 = vld.sshfl [vmem:[#allocation1 + $0x30] sm:$0xff pattern:$0x75316420]  ;;  %1411 = vmatpush.msra.mxu3 %v1380_v16  ;;  %v1364_v57 = vld [vmem:[%s2502_s3 + $0x140] sm:$0xff]  ;;  %v1333_v58 = vld [vmem:[%s2502_s3 + $0x48] sm:$0xff] }
  0xfc   : > { %v1243_v46 = vsel %vm1053_vm0, %v948_v60, 0.0  ;;  %v1330_v60 = vld [vmem:[%s2502_s3 + $0x30] sm:$0xff]  ;;  %v1356_v12 = vld [vmem:[%s2502_s3 + $0x100] sm:$0xff] }
  0xfd   : > { %v1244_v5 = vadd.f32 %v1243_v46, %v1242_v59  ;;  %v1365_v59 = vld [vmem:[%s2502_s3 + $0x148] sm:$0xff]  ;;  %v1363_v46 = vld [vmem:[%s2502_s3 + $0x138] sm:$0xff]  ;;  %v1326_v7 = vld [vmem:[%s2502_s3 + $0x10] sm:$0xff] }
  0xfe   : > { %v953_v9 = vld.sshfl [vmem:[#allocation1] sm:$0xff pattern:$0x75316420] }
  0xff   : > { %1266 = vst [vmem:[#allocation1] ss:$2 sm:$0xff] %v1263_v22  ;;  %v1245_v62 = vsel %vm1053_vm0, %v953_v9, 0.0  ;;  %v1378_v22 = vld [vmem:[%s2502_s3 + $0x1b0] sm:$0xff]  ;;  %v1344_v9 = vld [vmem:[%s2502_s3 + $0xa0] sm:$0xff] }
 0x100   : > { %v954_v4 = vld.sshfl [vmem:[#allocation1 + $0x10] sm:$0xff pattern:$0x75316420]  ;;  %v1246_v13 = vadd.f32 %v1245_v62, %v1244_v5  ;;  %1412 = vmatpush.msra.mxu3 %v1378_v22  ;;  %1393 = vmatpush.msra.mxu2 %v1344_v9  ;;  %v1361_v5 = vld [vmem:[%s2502_s3 + $0x128] sm:$0xff] }
 0x101   : > { %v1247_v10 = vsel %vm1053_vm0, %v954_v4, 0.0  ;;  %v1329_v4 = vld [vmem:[%s2502_s3 + $0x28] sm:$0xff] }
 0x102   : > { %v1248_v20 = vadd.f32 %v1247_v10, %v1246_v13  ;;  %1413 = vmatpush.msra.mxu3 %v1376_v26  ;;  %1394 = vmatpush.msra.mxu2 %v1342_v31  ;;  %v1327_v10 = vld [vmem:[%s2502_s3 + $0x18] sm:$0xff]  ;;  %v1325_v13 = vld [vmem:[%s2502_s3 + $0x8] sm:$0xff]  ;;  %v1474_v26 = vlaneseq }
 0x104   : > { %v1249_v1 = vrot.slane %v1248_v20, 4  ;;  %1414 = vmatpush.msra.mxu3 %v1374_v18  ;;  %1395 = vmatpush.msra.mxu2 %v1340_v29  ;;  %vm1476_vm4 = vcmp.lt.s32.totalorder %v1474_v26, 256 }
 0x106   : > { %v1267_v42 = vld.sshfl [vmem:[#allocation1] sm:$0xff pattern:$0x75316420]  ;;  %v1268_v43 = vld.sshfl [vmem:[#allocation1 + $0x8] sm:$0xff pattern:$0x75316420]  ;;  %v1250_v15 = vadd.f32 %v1249_v1, %v1248_v20  ;;  %1415 = vmatpush.msra.mxu3 %v1372_v35  ;;  %1396 = vmatpush.msra.mxu2 %v1338_v30 }
 0x107   : > { %1578 = vmatpush.msk.msra.mxu0 %vm1277_vm2, %v1267_v42  ;;  %1580 = vmatpush.msk.msra.mxu1 %vm1277_vm2, %v1268_v43  ;;  %v1371_v42 = vld [vmem:[%s2502_s3 + $0x178] sm:$0xff] }
 0x108   : > { %v1251_v33 = vrot.slane %v1250_v15, 2  ;;  %1416 = vmatpush.msra.mxu3 %v1370_v38  ;;  %1397 = vmatpush.msra.mxu2 %v1336_v44 }
 0x109   : > { %1428 = vmatpush.msrb.mxu0 %v1355_v63  ;;  %1448 = vmatpush.msrb.mxu1 %v1387_v0  ;;  %v1328_v0 = vld [vmem:[%s2502_s3 + $0x20] sm:$0xff] }
 0x10a   : > { %v1252_v39 = vadd.f32 %v1251_v33, %v1250_v15  ;;  %1417 = vmatpush.msra.mxu3 %v1368_v45  ;;  %1398 = vmatpush.msra.mxu2 %v1334_v49 }
 0x10b   : > { %1429 = vmatpush.msrb.mxu0 %v1353_v8  ;;  %1449 = vmatpush.msrb.mxu1 %v1385_v6  ;;  %v1358_v8 = vld [vmem:[%s2502_s3 + $0x110] sm:$0xff]  ;;  %v1359_v6 = vld [vmem:[%s2502_s3 + $0x118] sm:$0xff] }
 0x10c   : > { %v1253_v43 = vrot.slane %v1252_v39, 1  ;;  %1418 = vmatpush.msra.mxu3 %v1366_v52  ;;  %1399 = vmatpush.msra.mxu2 %v1332_v56 }
 0x10d   : > { %1430 = vmatpush.msrb.mxu0 %v1351_v51  ;;  %1450 = vmatpush.msrb.mxu1 %v1383_v2  ;;  %v1357_v51 = vld [vmem:[%s2502_s3 + $0x108] sm:$0xff]  ;;  %v1264_v2 = vld [vmem:[%s2501_s2] sm:$0x3] }
 0x10e   : > { %v1254_v48 = vadd.f32 %v1253_v43, %v1252_v39  ;;  %1419 = vmatpush.msra.mxu3 %v1364_v57  ;;  %1400 = vmatpush.msra.mxu2 %v1330_v60  ;;  %v1270_v14 = vperm.slane %v1264_v2, 0  ;;  %v1271_v16 = vperm.slane %v1264_v2, 1 }
 0x10f   : > { %1431 = vmatpush.msrb.mxu0 %v1349_v17  ;;  %1451 = vmatpush.msrb.mxu1 %v1381_v19 }
 0x110   : > { %v1255_v54 = vadd.f32 %v1254_v48, %v457_v47  ;;  %1420 = vmatpush.msra.mxu3 %v1362_v61  ;;  %1401 = vmatpush.msra.mxu2 %v1328_v0 }
 0x111   : > { %1432 = vmatpush.msrb.mxu0 %v1347_v23  ;;  %1452 = vmatpush.msrb.mxu1 %v1379_v25 }
 0x112   : > { %1257 = vst.msk [vmem:[#allocation2] sm:$0x1] %vm231_vm1, %v1255_v54  ;;  %1421 = vmatpush.msra.mxu3 %v1360_v3  ;;  %1402 = vmatpush.msra.mxu2 %v1326_v7 }
 0x113   : > { %1433 = vmatpush.msrb.mxu0 %v1345_v27  ;;  %1453 = vmatpush.msrb.mxu1 %v1377_v28 }
 0x114   : > { %1422 = vmatpush.msra.mxu3 %v1358_v8  ;;  %1403 = vmatpush.msra.mxu2 %v1324_v11 }
 0x115   : > { %1434 = vmatpush.msrb.mxu0 %v1343_v32  ;;  %1454 = vmatpush.msrb.mxu1 %v1375_v24 }
 0x116   : > { %1423 = vmatpush.msra.mxu3 %v1356_v12 }
 0x117   : > { %1435 = vmatpush.msrb.mxu0 %v1341_v36  ;;  %1455 = vmatpush.msrb.mxu1 %v1373_v37 }
 0x119   : > { %1436 = vmatpush.msrb.mxu0 %v1339_v41  ;;  %1456 = vmatpush.msrb.mxu1 %v1371_v42  ;;  %v1261_v62 = vld [vmem:[#allocation2] sm:$0x1] }
 0x11a   : > { %v1262_v63 = vmul.f32 0.00390625, %v1261_v62 }
 0x11b   : > { %1437 = vmatpush.msrb.mxu0 %v1337_v34  ;;  %1457 = vmatpush.msrb.mxu1 %v1369_v40 }
 0x11c   : > { %1579 = vmatmul.msk.f32.vlgmr.msra.gmra.mxu0 %vm1053_vm0, %v1262_v63  ;;  %1581 = vmatmul.msk.f32.vlgmr.msra.gmra.mxu1 %vm1053_vm0, %v1262_v63 }
 0x11d   : > { %1438 = vmatpush.msrb.mxu0 %v1335_v53  ;;  %1458 = vmatpush.msrb.mxu1 %v1367_v55 }
 0x11f   : > { %1439 = vmatpush.msrb.mxu0 %v1333_v58  ;;  %1459 = vmatpush.msrb.mxu1 %v1365_v59 }
 0x121   : > { %1440 = vmatpush.msrb.mxu0 %v1331_v50  ;;  %1460 = vmatpush.msrb.mxu1 %v1363_v46 }
 0x123   : > { %1441 = vmatpush.msrb.mxu0 %v1329_v4  ;;  %1461 = vmatpush.msrb.mxu1 %v1361_v5 }
 0x125   : > { %1442 = vmatpush.msrb.mxu0 %v1327_v10  ;;  %1462 = vmatpush.msrb.mxu1 %v1359_v6 }
 0x127   : > { %1443 = vmatpush.msrb.mxu0 %v1325_v13  ;;  %1463 = vmatpush.msrb.mxu1 %v1357_v51 }
 0x199   : > { %v1299_v17 = vpop.f32.mrf.mxu0  ;;  %v1319_v19 = vpop.f32.mrf.mxu1 }
 0x19a   : > { %v1300_v20 = vadd.f32 %v1299_v17, %v1270_v14  ;;  %v1320_v21 = vadd.f32 %v1319_v19, %v1271_v16 }
 0x19c   : > { %v1322_v22 = vmax.f32 %v1300_v20, 0.0  ;;  %v1323_v23 = vmax.f32 %v1320_v21, 0.0 }
 0x19e   : > { %1404 = vmatmul.f32.vlgmr.msra.gmra.mxu2 %v1322_v22  ;;  %1424 = vmatmul.f32.vlgmr.msra.gmra.mxu3 %v1323_v23 }
 0x19f   : > { %1444 = vmatmul.f32.vlgmr.msrb.gmra.mxu0 %v1322_v22  ;;  %1464 = vmatmul.f32.vlgmr.msrb.gmra.mxu1 %v1323_v23 }
 0x21c   : > { %v1445_v25 = vpop.f32.mrf.mxu0  ;;  %v1465_v1 = vpop.f32.mrf.mxu1 }
 0x21d   : > { %v1466_v9 = vadd.f32 %v1465_v1, %v1445_v25 }
 0x21f   : > { %v1470_v15 = vrot.slane %v1466_v9, 7 }
 0x221   : > { %v1405_v27 = vpop.f32.mrf.mxu2  ;;  %v1425_v28 = vpop.f32.mrf.mxu3 }
 0x222   : > { %v1426_v31 = vadd.f32 %v1425_v28, %v1405_v27 }
 0x224   : > { %v1472_v18 = vsel %vm1471_vm3, %v1426_v31, %v1470_v15 }
 0x225   : > { %1478 = vst.msk [vmem:[%s215_s26] sm:$0x3] %vm1476_vm4, %v1472_v18 }
 0x226   : > { %1809 = shalt.err (!%p1806_p5)
}
 0x227   : > { %1726 = dma.vmem_to_hbm [thread:$0]  (%p1928_p4), %s1493_s29, 32, %s1495_s30, %s1480_s18  }
 0x228 PF: > { %p1732_p6 = scmp.ge.s32.totalorder %s1860_s20, 2  ;;  %s1506_s12 = sand.u32 1, %s1840_s15  }
 0x229   : > { %s1507_s13 = scalar_lea.sflag [#allocation4], %s1506_s12 }
 0x22a   : > { %p1729_p7 = pnand %p1732_p6, %p1935_p8 }
 0x22c   : > { %p1730_p9 = pneg %p1729_p7 }
 0x22e   : > { %1835 = dma.done.wait (%p1730_p9), %s1507_s13, 32  }
 0x22f   : > { %1837 = vsyncadd (%p1730_p9), %s1507_s13, 4294967264  ;;  %s17_s20 = sadd.s32 1, %s1860_s20   ;;  %s2506_s15 = smov %s1844_s16 }
 0x230   : > { %p14_p10 = scmp.ge.s32.totalorder %s17_s20, 4   ;;  %s2507_s16 = smov %s1848_s17 }
 0x231   : > { %s2508_s17 = smov %s1941_s28  ;;  %s2509_s18 = smov %s1856_s19 }
 0x232   : > { %s2510_s19 = smov %s2512_s23  ;;  %16 = sbr.rel (!%p14_p10) target bundleno = 4 (0x4), region = 86 }
 0x237   :  { %1513 = vsyncpa [#allocation4], 1 }
 0x238   :  { %1515 = vsyncpa [#allocation4 + $0x1], 1 }

</bundles_post_ra>
